<compile_context>
chip_gen: v5e
topology: v5e:2x2
jax: 0.10.0
libtpu: 0.0.40
codegen_flags: <defaults>
</compile_context>

<pallas_src>
import functools

import jax
import jax.numpy as jnp
from jax import lax
from jax.experimental import pallas as pl
from jax.experimental.pallas import tpu as pltpu

NEG_SLOPE = 0.01  # nn.LeakyReLU default negative_slope


# ------------------------------ Fused forward kernel ------------------------------
def _cnn_block_kernel(xp_ref, wlane_ref, cb_ref, wbig_ref, fcb_ref, o_ref, *, C, Wh):
    """Conv1+softmax -> maxpool(2,2) -> Conv1+leaky_relu -> fc1+leaky_relu, lane-packed.

    xp_ref   : (4, Hh, C*Wh) VMEM  -- parity slab 2p+q holds, in channel segment ci,
                                      x[ci, p::2, q::2] (channels packed along lanes).
    wlane_ref: (C*9, C*Wh)  VMEM  -- row (r*3+kh)*3+kw, segment ci = conv_w[(ci+r)%C, ci, kh, kw].
    cb_ref   : (1, C*Wh)    VMEM  -- conv bias, segment co = conv_b[co].
    wbig_ref : (C*Wh, 128)  VMEM  -- block-diagonal fc weight: [ci*Wh+j, ci*K+k] = fc_w[k, j].
    fcb_ref  : (1, 128)     VMEM  -- fc bias tiled per channel (zero-padded lanes).
    o_ref    : (H2, 128)    VMEM  -- column co*K+k = output[co, row, k]; lane-dense store.
    """
    L = C * Wh                    # packed lane width (channel segments side by side)
    Hh = xp_ref.shape[1]
    H1p = Hh - 1                  # rows after conv1(3x3 VALID) + 2x2/2 maxpool
    H2 = H1p - 2                  # rows after conv2

    def rot(x, k):
        """Static cyclic right-rotation of the lane axis by k (k<0 -> left rotation)."""
        k = k % L
        if k == 0:
            return x
        return jnp.concatenate([x[:, L - k:], x[:, :L - k]], axis=-1)

    def wrow(r, kh, kw, rows):
        """Packed conv weight row, broadcast once to `rows` sublanes (hoisted reuse)."""
        idx = (r * 3 + kh) * 3 + kw
        return jnp.broadcast_to(wlane_ref[pl.ds(idx, 1), :], (rows, L))

    # ---- Hoisted shifted parity input slabs: S[(p, q, oh, ow)] -----------------------
    S = {}
    for p in range(2):
        for q in range(2):
            slab = xp_ref[2 * p + q]                       # (Hh, L)
            for oh in range(2):
                rows = slab[oh:oh + H1p, :]
                for ow in range(2):
                    S[(p, q, oh, ow)] = rot(rows, -ow) if ow else rows

    # ---- Conv1 on packed lanes, all 4 output parities ----------------------------------
    # acc[a][b][r] accumulates, in channel segment ci, w[(ci+r)%C, ci, kh, kw] * x[ci, ...];
    # the cross-channel combine is C-1 cyclic rotations per parity afterwards.
    acc = [[[None] * C for _ in range(2)] for _ in range(2)]
    for r in range(C):
        for kh in range(3):
            for kw in range(3):
                wl = wrow(r, kh, kw, H1p)                  # one broadcast, 4 uses
                for a in range(2):
                    pa, oh = (a + kh) & 1, (a + kh) >> 1
                    for b in range(2):
                        pb, ow = (b + kw) & 1, (b + kw) >> 1
                        t = wl * S[(pa, pb, oh, ow)]
                        acc[a][b][r] = t if acc[a][b][r] is None else acc[a][b][r] + t

    cb1 = jnp.broadcast_to(cb_ref[...], (H1p, L))          # conv bias, hoisted broadcast

    # ---- channel softmax (dim=1) + 2x2/2 maxpool (elementwise max over parities) -------
    pooled = None
    for a in range(2):
        for b in range(2):
            out = acc[a][b][0] + cb1
            for r in range(1, C):
                out = out + rot(acc[a][b][r], r * Wh)      # cross-channel combine
            ro = [out] + [rot(out, r * Wh) for r in range(1, C)]
            m = ro[0]
            for t in ro[1:]:
                m = jnp.maximum(m, t)                      # per-lane max over the C channels
            es = [jnp.exp(t - m) for t in ro]              # EUP; reuses the rotations
            den = es[0]
            for t in es[1:]:
                den = den + t
            # exact reciprocal: negligible cost (4/image) and keeps numerics well inside the
            # test tolerance now that fc1 also picks up MXU rounding.
            sm = es[0] * pl.reciprocal(den, approx=False)
            pooled = sm if pooled is None else jnp.maximum(pooled, sm)

    # ---- Conv2 (same Conv1 weights) on the pooled packed slab + LeakyReLU --------------
    P = {}
    for kh in range(3):
        rows = pooled[kh:kh + H2, :]
        for kw in range(3):
            P[(kh, kw)] = rot(rows, -kw) if kw else rows
    acc2 = [None] * C
    for r in range(C):
        for kh in range(3):
            for kw in range(3):
                t = wrow(r, kh, kw, H2) * P[(kh, kw)]
                acc2[r] = t if acc2[r] is None else acc2[r] + t
    y2 = acc2[0] + jnp.broadcast_to(cb_ref[...], (H2, L))
    for r in range(1, C):
        y2 = y2 + rot(acc2[r], r * Wh)
    y2 = jnp.where(y2 >= 0, y2, NEG_SLOPE * y2)

    # ---- fc1: one MXU matmul over the packed lanes + LeakyReLU, single dense store -----
    z = jnp.dot(y2, wbig_ref[...], preferred_element_type=jnp.float32) + fcb_ref[...]
    o_ref[...] = jnp.where(z >= 0, z, NEG_SLOPE * z)


@jax.jit
def cnn_block_forward(x, conv_w, conv_b, fc_w, fc_b):
    N, C, H, W = x.shape
    K, fc_in = fc_w.shape
    assert H % 2 == 0 and W % 2 == 0, "maxpool(2,2) parity layout assumes even H, W"
    Hh, Wh = H // 2, W // 2
    H1p, W1p = Hh - 1, Wh - 1               # after conv1 + maxpool
    H2, W2 = H1p - 2, W1p - 2               # after conv2
    assert W2 == fc_in, (W2, fc_in)
    L = C * Wh
    FCN = 128                               # lane-dense fc output width (first C*K cols used)

    # XLA-side layout plumbing: one transpose -> parity slabs with channels packed on lanes.
    xp = (x.reshape(N, C, Hh, 2, Wh, 2)
            .transpose(0, 3, 5, 2, 1, 4)
            .reshape(N, 4, Hh, L))

    # Packed weight prep (tiny; in a real model this would be hoisted/cached once).
    w_perm = jnp.stack([jnp.stack([conv_w[(ci + r) % C, ci] for ci in range(C)], axis=0)
                        for r in range(C)], axis=0)                     # (r, ci, 3, 3)
    wlane = jnp.repeat(jnp.transpose(w_perm, (0, 2, 3, 1))[..., None], Wh, axis=-1)
    wlane = wlane.reshape(C * 9, L)
    cb_lane = jnp.repeat(conv_b[:, None], Wh, axis=1).reshape(1, L)
    fc_w_p = jnp.pad(fc_w, ((0, 0), (0, Wh - fc_in)))                   # (K, Wh)
    wbig = jnp.einsum("ab,kj->ajbk", jnp.eye(C, dtype=x.dtype), fc_w_p).reshape(L, C * K)
    wbig = jnp.pad(wbig, ((0, 0), (0, FCN - C * K)))                    # (L, 128)
    fcb_row = jnp.pad(jnp.tile(fc_b, C), (0, FCN - C * K)).reshape(1, FCN)

    kernel = functools.partial(_cnn_block_kernel, C=C, Wh=Wh)
    out = pl.pallas_call(
        kernel,
        out_shape=jax.ShapeDtypeStruct((N, H2, FCN), jnp.float32),
        grid=(N,),
        in_specs=[
            pl.BlockSpec((None, 4, Hh, L), lambda n: (n, 0, 0, 0)),     # packed parity input
            pl.BlockSpec((C * 9, L), lambda n: (0, 0)),                 # packed conv weights
            pl.BlockSpec((1, L), lambda n: (0, 0)),                     # packed conv bias
            pl.BlockSpec((L, FCN), lambda n: (0, 0)),                   # block-diag fc weight
            pl.BlockSpec((1, FCN), lambda n: (0, 0)),                   # packed fc bias
        ],
        out_specs=pl.BlockSpec((None, H2, FCN), lambda n: (n, 0, 0)),
        compiler_params=pltpu.CompilerParams(dimension_semantics=("parallel",)),
    )(xp, wlane, cb_lane, wbig, fcb_row)

    # (N, H2, C*K) column co*K+k  ->  (N, C, H2, K)
    return out[:, :, :C * K].reshape(N, H2, C, K).transpose(0, 2, 1, 3)


# --------------------------- Pure-JAX reference check --------------------------
def reference_forward(x, conv_w, conv_b, fc_w, fc_b):
    hp = lax.Precision.HIGHEST

    def conv(v):
        y = lax.conv_general_dilated(
            v, conv_w, window_strides=(1, 1), padding="VALID",
            dimension_numbers=("NCHW", "OIHW", "NCHW"), precision=hp)
        return y + conv_b[None, :, None, None]

    y = jax.nn.softmax(conv(x), axis=1)
    y = lax.reduce_window(y, -jnp.inf, lax.max, (1, 1, 2, 2), (1, 1, 2, 2), "VALID")
    y = jax.nn.leaky_relu(conv(y), negative_slope=NEG_SLOPE)
    y = jnp.einsum("nchw,kw->nchk", y, fc_w, precision=hp) + fc_b
    return jax.nn.leaky_relu(y, negative_slope=NEG_SLOPE)


if __name__ == "__main__":
    in_channels, num_classes = 3, 2
    N, H, W = 2, 14, 70   # W=70 -> 68 -> 34 -> 32, consistent with fc1 = Linear(32, 2)

    key = jax.random.PRNGKey(0)
    kx, kw1, kb1, kw2, kb2 = jax.random.split(key, 5)
    x = jax.random.normal(kx, (N, in_channels, H, W), jnp.float32)
    conv_w = 0.1 * jax.random.normal(kw1, (in_channels, in_channels, 3, 3), jnp.float32)
    conv_b = 0.1 * jax.random.normal(kb1, (in_channels,), jnp.float32)
    fc_w = 0.1 * jax.random.normal(kw2, (num_classes, 32), jnp.float32)
    fc_b = 0.1 * jax.random.normal(kb2, (num_classes,), jnp.float32)

    out = jax.block_until_ready(cnn_block_forward(x, conv_w, conv_b, fc_w, fc_b))
    ref = jax.block_until_ready(reference_forward(x, conv_w, conv_b, fc_w, fc_b))

    assert out.shape == (N, in_channels, 4, num_classes), out.shape
    max_err = float(jnp.max(jnp.abs(out - ref)))
    assert jnp.allclose(out, ref, rtol=5e-3, atol=5e-3), f"max_err={max_err}"
    print("KERNEL_OK")
</pallas_src>

<mosaic_0001>
module attributes {stable_mosaic.version = 11 : i64} {
  func.func @_cnn_block_kernel(%arg0: i32, %arg1: memref<1x4x7x105xf32, #tpu.memory_space<vmem>>, %arg2: memref<27x105xf32, #tpu.memory_space<vmem>>, %arg3: memref<1x105xf32, #tpu.memory_space<vmem>>, %arg4: memref<105x128xf32, #tpu.memory_space<vmem>>, %arg5: memref<1x128xf32, #tpu.memory_space<vmem>>, %arg6: memref<1x4x128xf32, #tpu.memory_space<vmem>>) attributes {dimension_semantics = [#tpu.dimension_semantics<parallel>], iteration_bounds = array<i64: 2>, scalar_prefetch = 0 : i64, scratch_operands = 0 : i64, tpu.core_type = #tpu.core_type<tc>, window_params = [{transform_indices = @transform_0, window_bounds = array<i64: 1, 4, 7, 105>}, {pipeline_mode = #tpu.pipeline_mode<synchronous>, transform_indices = @transform_1, window_bounds = array<i64: 27, 105>}, {pipeline_mode = #tpu.pipeline_mode<synchronous>, transform_indices = @transform_2, window_bounds = array<i64: 1, 105>}, {pipeline_mode = #tpu.pipeline_mode<synchronous>, transform_indices = @transform_3, window_bounds = array<i64: 105, 128>}, {pipeline_mode = #tpu.pipeline_mode<synchronous>, transform_indices = @transform_4, window_bounds = array<i64: 1, 128>}, {transform_indices = @transform_5, window_bounds = array<i64: 1, 4, 128>}]} {
    %c0 = arith.constant 0 : index
    %c0_0 = arith.constant 0 : index
    %c0_1 = arith.constant 0 : index
    %c0_2 = arith.constant 0 : index
    %0 = vector.load %arg1[%c0, %c0_0, %c0_1, %c0_2] : memref<1x4x7x105xf32, #tpu.memory_space<vmem>>, vector<1x1x7x105xf32>
    %1 = vector.shape_cast %0 : vector<1x1x7x105xf32> to vector<7x105xf32>
    %2 = vector.extract_strided_slice %1 {offsets = [0, 0], sizes = [6, 105], strides = [1, 1]} : vector<7x105xf32> to vector<6x105xf32>
    %3 = vector.extract_strided_slice %2 {offsets = [0, 1], sizes = [6, 104], strides = [1, 1]} : vector<6x105xf32> to vector<6x104xf32>
    %4 = vector.extract_strided_slice %2 {offsets = [0, 0], sizes = [6, 1], strides = [1, 1]} : vector<6x105xf32> to vector<6x1xf32>
    %5 = tpu.concatenate %3, %4 in 1 : vector<6x104xf32>, vector<6x1xf32> -> vector<6x105xf32>
    %6 = vector.extract_strided_slice %1 {offsets = [1, 0], sizes = [6, 105], strides = [1, 1]} : vector<7x105xf32> to vector<6x105xf32>
    %7 = vector.extract_strided_slice %6 {offsets = [0, 1], sizes = [6, 104], strides = [1, 1]} : vector<6x105xf32> to vector<6x104xf32>
    %8 = vector.extract_strided_slice %6 {offsets = [0, 0], sizes = [6, 1], strides = [1, 1]} : vector<6x105xf32> to vector<6x1xf32>
    %9 = tpu.concatenate %7, %8 in 1 : vector<6x104xf32>, vector<6x1xf32> -> vector<6x105xf32>
    %c0_3 = arith.constant 0 : index
    %c1 = arith.constant 1 : index
    %c0_4 = arith.constant 0 : index
    %c0_5 = arith.constant 0 : index
    %10 = vector.load %arg1[%c0_3, %c1, %c0_4, %c0_5] : memref<1x4x7x105xf32, #tpu.memory_space<vmem>>, vector<1x1x7x105xf32>
    %11 = vector.shape_cast %10 : vector<1x1x7x105xf32> to vector<7x105xf32>
    %12 = vector.extract_strided_slice %11 {offsets = [0, 0], sizes = [6, 105], strides = [1, 1]} : vector<7x105xf32> to vector<6x105xf32>
    %13 = vector.extract_strided_slice %12 {offsets = [0, 1], sizes = [6, 104], strides = [1, 1]} : vector<6x105xf32> to vector<6x104xf32>
    %14 = vector.extract_strided_slice %12 {offsets = [0, 0], sizes = [6, 1], strides = [1, 1]} : vector<6x105xf32> to vector<6x1xf32>
    %15 = tpu.concatenate %13, %14 in 1 : vector<6x104xf32>, vector<6x1xf32> -> vector<6x105xf32>
    %16 = vector.extract_strided_slice %11 {offsets = [1, 0], sizes = [6, 105], strides = [1, 1]} : vector<7x105xf32> to vector<6x105xf32>
    %17 = vector.extract_strided_slice %16 {offsets = [0, 1], sizes = [6, 104], strides = [1, 1]} : vector<6x105xf32> to vector<6x104xf32>
    %18 = vector.extract_strided_slice %16 {offsets = [0, 0], sizes = [6, 1], strides = [1, 1]} : vector<6x105xf32> to vector<6x1xf32>
    %19 = tpu.concatenate %17, %18 in 1 : vector<6x104xf32>, vector<6x1xf32> -> vector<6x105xf32>
    %c0_6 = arith.constant 0 : index
    %c2 = arith.constant 2 : index
    %c0_7 = arith.constant 0 : index
    %c0_8 = arith.constant 0 : index
    %20 = vector.load %arg1[%c0_6, %c2, %c0_7, %c0_8] : memref<1x4x7x105xf32, #tpu.memory_space<vmem>>, vector<1x1x7x105xf32>
    %21 = vector.shape_cast %20 : vector<1x1x7x105xf32> to vector<7x105xf32>
    %22 = vector.extract_strided_slice %21 {offsets = [0, 0], sizes = [6, 105], strides = [1, 1]} : vector<7x105xf32> to vector<6x105xf32>
    %23 = vector.extract_strided_slice %22 {offsets = [0, 1], sizes = [6, 104], strides = [1, 1]} : vector<6x105xf32> to vector<6x104xf32>
    %24 = vector.extract_strided_slice %22 {offsets = [0, 0], sizes = [6, 1], strides = [1, 1]} : vector<6x105xf32> to vector<6x1xf32>
    %25 = tpu.concatenate %23, %24 in 1 : vector<6x104xf32>, vector<6x1xf32> -> vector<6x105xf32>
    %26 = vector.extract_strided_slice %21 {offsets = [1, 0], sizes = [6, 105], strides = [1, 1]} : vector<7x105xf32> to vector<6x105xf32>
    %27 = vector.extract_strided_slice %26 {offsets = [0, 1], sizes = [6, 104], strides = [1, 1]} : vector<6x105xf32> to vector<6x104xf32>
    %28 = vector.extract_strided_slice %26 {offsets = [0, 0], sizes = [6, 1], strides = [1, 1]} : vector<6x105xf32> to vector<6x1xf32>
    %29 = tpu.concatenate %27, %28 in 1 : vector<6x104xf32>, vector<6x1xf32> -> vector<6x105xf32>
    %c0_9 = arith.constant 0 : index
    %c3 = arith.constant 3 : index
    %c0_10 = arith.constant 0 : index
    %c0_11 = arith.constant 0 : index
    %30 = vector.load %arg1[%c0_9, %c3, %c0_10, %c0_11] : memref<1x4x7x105xf32, #tpu.memory_space<vmem>>, vector<1x1x7x105xf32>
    %31 = vector.shape_cast %30 : vector<1x1x7x105xf32> to vector<7x105xf32>
    %32 = vector.extract_strided_slice %31 {offsets = [0, 0], sizes = [6, 105], strides = [1, 1]} : vector<7x105xf32> to vector<6x105xf32>
    %33 = vector.extract_strided_slice %32 {offsets = [0, 1], sizes = [6, 104], strides = [1, 1]} : vector<6x105xf32> to vector<6x104xf32>
    %34 = vector.extract_strided_slice %32 {offsets = [0, 0], sizes = [6, 1], strides = [1, 1]} : vector<6x105xf32> to vector<6x1xf32>
    %35 = tpu.concatenate %33, %34 in 1 : vector<6x104xf32>, vector<6x1xf32> -> vector<6x105xf32>
    %36 = vector.extract_strided_slice %31 {offsets = [1, 0], sizes = [6, 105], strides = [1, 1]} : vector<7x105xf32> to vector<6x105xf32>
    %37 = vector.extract_strided_slice %36 {offsets = [0, 1], sizes = [6, 104], strides = [1, 1]} : vector<6x105xf32> to vector<6x104xf32>
    %38 = vector.extract_strided_slice %36 {offsets = [0, 0], sizes = [6, 1], strides = [1, 1]} : vector<6x105xf32> to vector<6x1xf32>
    %39 = tpu.concatenate %37, %38 in 1 : vector<6x104xf32>, vector<6x1xf32> -> vector<6x105xf32>
    %c0_12 = arith.constant 0 : index
    %c0_13 = arith.constant 0 : index
    %40 = vector.load %arg2[%c0_12, %c0_13] : memref<27x105xf32, #tpu.memory_space<vmem>>, vector<1x105xf32>
    %41 = vector.shape_cast %40 : vector<1x105xf32> to vector<1x105xf32>
    %42 = vector.broadcast %41 : vector<1x105xf32> to vector<6x105xf32>
    %43 = arith.mulf %42, %2 : vector<6x105xf32>
    %44 = arith.mulf %42, %12 : vector<6x105xf32>
    %45 = arith.mulf %42, %22 : vector<6x105xf32>
    %46 = arith.mulf %42, %32 : vector<6x105xf32>
    %c1_14 = arith.constant 1 : index
    %c0_15 = arith.constant 0 : index
    %47 = vector.load %arg2[%c1_14, %c0_15] : memref<27x105xf32, #tpu.memory_space<vmem>>, vector<1x105xf32>
    %48 = vector.shape_cast %47 : vector<1x105xf32> to vector<1x105xf32>
    %49 = vector.broadcast %48 : vector<1x105xf32> to vector<6x105xf32>
    %50 = arith.mulf %49, %12 : vector<6x105xf32>
    %51 = arith.addf %43, %50 : vector<6x105xf32>
    %52 = arith.mulf %49, %5 : vector<6x105xf32>
    %53 = arith.addf %44, %52 : vector<6x105xf32>
    %54 = arith.mulf %49, %32 : vector<6x105xf32>
    %55 = arith.addf %45, %54 : vector<6x105xf32>
    %56 = arith.mulf %49, %25 : vector<6x105xf32>
    %57 = arith.addf %46, %56 : vector<6x105xf32>
    %c2_16 = arith.constant 2 : index
    %c0_17 = arith.constant 0 : index
    %58 = vector.load %arg2[%c2_16, %c0_17] : memref<27x105xf32, #tpu.memory_space<vmem>>, vector<1x105xf32>
    %59 = vector.shape_cast %58 : vector<1x105xf32> to vector<1x105xf32>
    %60 = vector.broadcast %59 : vector<1x105xf32> to vector<6x105xf32>
    %61 = arith.mulf %60, %5 : vector<6x105xf32>
    %62 = arith.addf %51, %61 : vector<6x105xf32>
    %63 = arith.mulf %60, %15 : vector<6x105xf32>
    %64 = arith.addf %53, %63 : vector<6x105xf32>
    %65 = arith.mulf %60, %25 : vector<6x105xf32>
    %66 = arith.addf %55, %65 : vector<6x105xf32>
    %67 = arith.mulf %60, %35 : vector<6x105xf32>
    %68 = arith.addf %57, %67 : vector<6x105xf32>
    %c3_18 = arith.constant 3 : index
    %c0_19 = arith.constant 0 : index
    %69 = vector.load %arg2[%c3_18, %c0_19] : memref<27x105xf32, #tpu.memory_space<vmem>>, vector<1x105xf32>
    %70 = vector.shape_cast %69 : vector<1x105xf32> to vector<1x105xf32>
    %71 = vector.broadcast %70 : vector<1x105xf32> to vector<6x105xf32>
    %72 = arith.mulf %71, %22 : vector<6x105xf32>
    %73 = arith.addf %62, %72 : vector<6x105xf32>
    %74 = arith.mulf %71, %32 : vector<6x105xf32>
    %75 = arith.addf %64, %74 : vector<6x105xf32>
    %76 = arith.mulf %71, %6 : vector<6x105xf32>
    %77 = arith.addf %66, %76 : vector<6x105xf32>
    %78 = arith.mulf %71, %16 : vector<6x105xf32>
    %79 = arith.addf %68, %78 : vector<6x105xf32>
    %c4 = arith.constant 4 : index
    %c0_20 = arith.constant 0 : index
    %80 = vector.load %arg2[%c4, %c0_20] : memref<27x105xf32, #tpu.memory_space<vmem>>, vector<1x105xf32>
    %81 = vector.shape_cast %80 : vector<1x105xf32> to vector<1x105xf32>
    %82 = vector.broadcast %81 : vector<1x105xf32> to vector<6x105xf32>
    %83 = arith.mulf %82, %32 : vector<6x105xf32>
    %84 = arith.addf %73, %83 : vector<6x105xf32>
    %85 = arith.mulf %82, %25 : vector<6x105xf32>
    %86 = arith.addf %75, %85 : vector<6x105xf32>
    %87 = arith.mulf %82, %16 : vector<6x105xf32>
    %88 = arith.addf %77, %87 : vector<6x105xf32>
    %89 = arith.mulf %82, %9 : vector<6x105xf32>
    %90 = arith.addf %79, %89 : vector<6x105xf32>
    %c5 = arith.constant 5 : index
    %c0_21 = arith.constant 0 : index
    %91 = vector.load %arg2[%c5, %c0_21] : memref<27x105xf32, #tpu.memory_space<vmem>>, vector<1x105xf32>
    %92 = vector.shape_cast %91 : vector<1x105xf32> to vector<1x105xf32>
    %93 = vector.broadcast %92 : vector<1x105xf32> to vector<6x105xf32>
    %94 = arith.mulf %93, %25 : vector<6x105xf32>
    %95 = arith.addf %84, %94 : vector<6x105xf32>
    %96 = arith.mulf %93, %35 : vector<6x105xf32>
    %97 = arith.addf %86, %96 : vector<6x105xf32>
    %98 = arith.mulf %93, %9 : vector<6x105xf32>
    %99 = arith.addf %88, %98 : vector<6x105xf32>
    %100 = arith.mulf %93, %19 : vector<6x105xf32>
    %101 = arith.addf %90, %100 : vector<6x105xf32>
    %c6 = arith.constant 6 : index
    %c0_22 = arith.constant 0 : index
    %102 = vector.load %arg2[%c6, %c0_22] : memref<27x105xf32, #tpu.memory_space<vmem>>, vector<1x105xf32>
    %103 = vector.shape_cast %102 : vector<1x105xf32> to vector<1x105xf32>
    %104 = vector.broadcast %103 : vector<1x105xf32> to vector<6x105xf32>
    %105 = arith.mulf %104, %6 : vector<6x105xf32>
    %106 = arith.addf %95, %105 : vector<6x105xf32>
    %107 = arith.mulf %104, %16 : vector<6x105xf32>
    %108 = arith.addf %97, %107 : vector<6x105xf32>
    %109 = arith.mulf %104, %26 : vector<6x105xf32>
    %110 = arith.addf %99, %109 : vector<6x105xf32>
    %111 = arith.mulf %104, %36 : vector<6x105xf32>
    %112 = arith.addf %101, %111 : vector<6x105xf32>
    %c7 = arith.constant 7 : index
    %c0_23 = arith.constant 0 : index
    %113 = vector.load %arg2[%c7, %c0_23] : memref<27x105xf32, #tpu.memory_space<vmem>>, vector<1x105xf32>
    %114 = vector.shape_cast %113 : vector<1x105xf32> to vector<1x105xf32>
    %115 = vector.broadcast %114 : vector<1x105xf32> to vector<6x105xf32>
    %116 = arith.mulf %115, %16 : vector<6x105xf32>
    %117 = arith.addf %106, %116 : vector<6x105xf32>
    %118 = arith.mulf %115, %9 : vector<6x105xf32>
    %119 = arith.addf %108, %118 : vector<6x105xf32>
    %120 = arith.mulf %115, %36 : vector<6x105xf32>
    %121 = arith.addf %110, %120 : vector<6x105xf32>
    %122 = arith.mulf %115, %29 : vector<6x105xf32>
    %123 = arith.addf %112, %122 : vector<6x105xf32>
    %c8 = arith.constant 8 : index
    %c0_24 = arith.constant 0 : index
    %124 = vector.load %arg2[%c8, %c0_24] : memref<27x105xf32, #tpu.memory_space<vmem>>, vector<1x105xf32>
    %125 = vector.shape_cast %124 : vector<1x105xf32> to vector<1x105xf32>
    %126 = vector.broadcast %125 : vector<1x105xf32> to vector<6x105xf32>
    %127 = arith.mulf %126, %9 : vector<6x105xf32>
    %128 = arith.addf %117, %127 : vector<6x105xf32>
    %129 = arith.mulf %126, %19 : vector<6x105xf32>
    %130 = arith.addf %119, %129 : vector<6x105xf32>
    %131 = arith.mulf %126, %29 : vector<6x105xf32>
    %132 = arith.addf %121, %131 : vector<6x105xf32>
    %133 = arith.mulf %126, %39 : vector<6x105xf32>
    %134 = arith.addf %123, %133 : vector<6x105xf32>
    %c9 = arith.constant 9 : index
    %c0_25 = arith.constant 0 : index
    %135 = vector.load %arg2[%c9, %c0_25] : memref<27x105xf32, #tpu.memory_space<vmem>>, vector<1x105xf32>
    %136 = vector.shape_cast %135 : vector<1x105xf32> to vector<1x105xf32>
    %137 = vector.broadcast %136 : vector<1x105xf32> to vector<6x105xf32>
    %138 = arith.mulf %137, %2 : vector<6x105xf32>
    %139 = arith.mulf %137, %12 : vector<6x105xf32>
    %140 = arith.mulf %137, %22 : vector<6x105xf32>
    %141 = arith.mulf %137, %32 : vector<6x105xf32>
    %c10 = arith.constant 10 : index
    %c0_26 = arith.constant 0 : index
    %142 = vector.load %arg2[%c10, %c0_26] : memref<27x105xf32, #tpu.memory_space<vmem>>, vector<1x105xf32>
    %143 = vector.shape_cast %142 : vector<1x105xf32> to vector<1x105xf32>
    %144 = vector.broadcast %143 : vector<1x105xf32> to vector<6x105xf32>
    %145 = arith.mulf %144, %12 : vector<6x105xf32>
    %146 = arith.addf %138, %145 : vector<6x105xf32>
    %147 = arith.mulf %144, %5 : vector<6x105xf32>
    %148 = arith.addf %139, %147 : vector<6x105xf32>
    %149 = arith.mulf %144, %32 : vector<6x105xf32>
    %150 = arith.addf %140, %149 : vector<6x105xf32>
    %151 = arith.mulf %144, %25 : vector<6x105xf32>
    %152 = arith.addf %141, %151 : vector<6x105xf32>
    %c11 = arith.constant 11 : index
    %c0_27 = arith.constant 0 : index
    %153 = vector.load %arg2[%c11, %c0_27] : memref<27x105xf32, #tpu.memory_space<vmem>>, vector<1x105xf32>
    %154 = vector.shape_cast %153 : vector<1x105xf32> to vector<1x105xf32>
    %155 = vector.broadcast %154 : vector<1x105xf32> to vector<6x105xf32>
    %156 = arith.mulf %155, %5 : vector<6x105xf32>
    %157 = arith.addf %146, %156 : vector<6x105xf32>
    %158 = arith.mulf %155, %15 : vector<6x105xf32>
    %159 = arith.addf %148, %158 : vector<6x105xf32>
    %160 = arith.mulf %155, %25 : vector<6x105xf32>
    %161 = arith.addf %150, %160 : vector<6x105xf32>
    %162 = arith.mulf %155, %35 : vector<6x105xf32>
    %163 = arith.addf %152, %162 : vector<6x105xf32>
    %c12 = arith.constant 12 : index
    %c0_28 = arith.constant 0 : index
    %164 = vector.load %arg2[%c12, %c0_28] : memref<27x105xf32, #tpu.memory_space<vmem>>, vector<1x105xf32>
    %165 = vector.shape_cast %164 : vector<1x105xf32> to vector<1x105xf32>
    %166 = vector.broadcast %165 : vector<1x105xf32> to vector<6x105xf32>
    %167 = arith.mulf %166, %22 : vector<6x105xf32>
    %168 = arith.addf %157, %167 : vector<6x105xf32>
    %169 = arith.mulf %166, %32 : vector<6x105xf32>
    %170 = arith.addf %159, %169 : vector<6x105xf32>
    %171 = arith.mulf %166, %6 : vector<6x105xf32>
    %172 = arith.addf %161, %171 : vector<6x105xf32>
    %173 = arith.mulf %166, %16 : vector<6x105xf32>
    %174 = arith.addf %163, %173 : vector<6x105xf32>
    %c13 = arith.constant 13 : index
    %c0_29 = arith.constant 0 : index
    %175 = vector.load %arg2[%c13, %c0_29] : memref<27x105xf32, #tpu.memory_space<vmem>>, vector<1x105xf32>
    %176 = vector.shape_cast %175 : vector<1x105xf32> to vector<1x105xf32>
    %177 = vector.broadcast %176 : vector<1x105xf32> to vector<6x105xf32>
    %178 = arith.mulf %177, %32 : vector<6x105xf32>
    %179 = arith.addf %168, %178 : vector<6x105xf32>
    %180 = arith.mulf %177, %25 : vector<6x105xf32>
    %181 = arith.addf %170, %180 : vector<6x105xf32>
    %182 = arith.mulf %177, %16 : vector<6x105xf32>
    %183 = arith.addf %172, %182 : vector<6x105xf32>
    %184 = arith.mulf %177, %9 : vector<6x105xf32>
    %185 = arith.addf %174, %184 : vector<6x105xf32>
    %c14 = arith.constant 14 : index
    %c0_30 = arith.constant 0 : index
    %186 = vector.load %arg2[%c14, %c0_30] : memref<27x105xf32, #tpu.memory_space<vmem>>, vector<1x105xf32>
    %187 = vector.shape_cast %186 : vector<1x105xf32> to vector<1x105xf32>
    %188 = vector.broadcast %187 : vector<1x105xf32> to vector<6x105xf32>
    %189 = arith.mulf %188, %25 : vector<6x105xf32>
    %190 = arith.addf %179, %189 : vector<6x105xf32>
    %191 = arith.mulf %188, %35 : vector<6x105xf32>
    %192 = arith.addf %181, %191 : vector<6x105xf32>
    %193 = arith.mulf %188, %9 : vector<6x105xf32>
    %194 = arith.addf %183, %193 : vector<6x105xf32>
    %195 = arith.mulf %188, %19 : vector<6x105xf32>
    %196 = arith.addf %185, %195 : vector<6x105xf32>
    %c15 = arith.constant 15 : index
    %c0_31 = arith.constant 0 : index
    %197 = vector.load %arg2[%c15, %c0_31] : memref<27x105xf32, #tpu.memory_space<vmem>>, vector<1x105xf32>
    %198 = vector.shape_cast %197 : vector<1x105xf32> to vector<1x105xf32>
    %199 = vector.broadcast %198 : vector<1x105xf32> to vector<6x105xf32>
    %200 = arith.mulf %199, %6 : vector<6x105xf32>
    %201 = arith.addf %190, %200 : vector<6x105xf32>
    %202 = arith.mulf %199, %16 : vector<6x105xf32>
    %203 = arith.addf %192, %202 : vector<6x105xf32>
    %204 = arith.mulf %199, %26 : vector<6x105xf32>
    %205 = arith.addf %194, %204 : vector<6x105xf32>
    %206 = arith.mulf %199, %36 : vector<6x105xf32>
    %207 = arith.addf %196, %206 : vector<6x105xf32>
    %c16 = arith.constant 16 : index
    %c0_32 = arith.constant 0 : index
    %208 = vector.load %arg2[%c16, %c0_32] : memref<27x105xf32, #tpu.memory_space<vmem>>, vector<1x105xf32>
    %209 = vector.shape_cast %208 : vector<1x105xf32> to vector<1x105xf32>
    %210 = vector.broadcast %209 : vector<1x105xf32> to vector<6x105xf32>
    %211 = arith.mulf %210, %16 : vector<6x105xf32>
    %212 = arith.addf %201, %211 : vector<6x105xf32>
    %213 = arith.mulf %210, %9 : vector<6x105xf32>
    %214 = arith.addf %203, %213 : vector<6x105xf32>
    %215 = arith.mulf %210, %36 : vector<6x105xf32>
    %216 = arith.addf %205, %215 : vector<6x105xf32>
    %217 = arith.mulf %210, %29 : vector<6x105xf32>
    %218 = arith.addf %207, %217 : vector<6x105xf32>
    %c17 = arith.constant 17 : index
    %c0_33 = arith.constant 0 : index
    %219 = vector.load %arg2[%c17, %c0_33] : memref<27x105xf32, #tpu.memory_space<vmem>>, vector<1x105xf32>
    %220 = vector.shape_cast %219 : vector<1x105xf32> to vector<1x105xf32>
    %221 = vector.broadcast %220 : vector<1x105xf32> to vector<6x105xf32>
    %222 = arith.mulf %221, %9 : vector<6x105xf32>
    %223 = arith.addf %212, %222 : vector<6x105xf32>
    %224 = arith.mulf %221, %19 : vector<6x105xf32>
    %225 = arith.addf %214, %224 : vector<6x105xf32>
    %226 = arith.mulf %221, %29 : vector<6x105xf32>
    %227 = arith.addf %216, %226 : vector<6x105xf32>
    %228 = arith.mulf %221, %39 : vector<6x105xf32>
    %229 = arith.addf %218, %228 : vector<6x105xf32>
    %c18 = arith.constant 18 : index
    %c0_34 = arith.constant 0 : index
    %230 = vector.load %arg2[%c18, %c0_34] : memref<27x105xf32, #tpu.memory_space<vmem>>, vector<1x105xf32>
    %231 = vector.shape_cast %230 : vector<1x105xf32> to vector<1x105xf32>
    %232 = vector.broadcast %231 : vector<1x105xf32> to vector<6x105xf32>
    %233 = arith.mulf %232, %2 : vector<6x105xf32>
    %234 = arith.mulf %232, %12 : vector<6x105xf32>
    %235 = arith.mulf %232, %22 : vector<6x105xf32>
    %236 = arith.mulf %232, %32 : vector<6x105xf32>
    %c19 = arith.constant 19 : index
    %c0_35 = arith.constant 0 : index
    %237 = vector.load %arg2[%c19, %c0_35] : memref<27x105xf32, #tpu.memory_space<vmem>>, vector<1x105xf32>
    %238 = vector.shape_cast %237 : vector<1x105xf32> to vector<1x105xf32>
    %239 = vector.broadcast %238 : vector<1x105xf32> to vector<6x105xf32>
    %240 = arith.mulf %239, %12 : vector<6x105xf32>
    %241 = arith.addf %233, %240 : vector<6x105xf32>
    %242 = arith.mulf %239, %5 : vector<6x105xf32>
    %243 = arith.addf %234, %242 : vector<6x105xf32>
    %244 = arith.mulf %239, %32 : vector<6x105xf32>
    %245 = arith.addf %235, %244 : vector<6x105xf32>
    %246 = arith.mulf %239, %25 : vector<6x105xf32>
    %247 = arith.addf %236, %246 : vector<6x105xf32>
    %c20 = arith.constant 20 : index
    %c0_36 = arith.constant 0 : index
    %248 = vector.load %arg2[%c20, %c0_36] : memref<27x105xf32, #tpu.memory_space<vmem>>, vector<1x105xf32>
    %249 = vector.shape_cast %248 : vector<1x105xf32> to vector<1x105xf32>
    %250 = vector.broadcast %249 : vector<1x105xf32> to vector<6x105xf32>
    %251 = arith.mulf %250, %5 : vector<6x105xf32>
    %252 = arith.addf %241, %251 : vector<6x105xf32>
    %253 = arith.mulf %250, %15 : vector<6x105xf32>
    %254 = arith.addf %243, %253 : vector<6x105xf32>
    %255 = arith.mulf %250, %25 : vector<6x105xf32>
    %256 = arith.addf %245, %255 : vector<6x105xf32>
    %257 = arith.mulf %250, %35 : vector<6x105xf32>
    %258 = arith.addf %247, %257 : vector<6x105xf32>
    %c21 = arith.constant 21 : index
    %c0_37 = arith.constant 0 : index
    %259 = vector.load %arg2[%c21, %c0_37] : memref<27x105xf32, #tpu.memory_space<vmem>>, vector<1x105xf32>
    %260 = vector.shape_cast %259 : vector<1x105xf32> to vector<1x105xf32>
    %261 = vector.broadcast %260 : vector<1x105xf32> to vector<6x105xf32>
    %262 = arith.mulf %261, %22 : vector<6x105xf32>
    %263 = arith.addf %252, %262 : vector<6x105xf32>
    %264 = arith.mulf %261, %32 : vector<6x105xf32>
    %265 = arith.addf %254, %264 : vector<6x105xf32>
    %266 = arith.mulf %261, %6 : vector<6x105xf32>
    %267 = arith.addf %256, %266 : vector<6x105xf32>
    %268 = arith.mulf %261, %16 : vector<6x105xf32>
    %269 = arith.addf %258, %268 : vector<6x105xf32>
    %c22 = arith.constant 22 : index
    %c0_38 = arith.constant 0 : index
    %270 = vector.load %arg2[%c22, %c0_38] : memref<27x105xf32, #tpu.memory_space<vmem>>, vector<1x105xf32>
    %271 = vector.shape_cast %270 : vector<1x105xf32> to vector<1x105xf32>
    %272 = vector.broadcast %271 : vector<1x105xf32> to vector<6x105xf32>
    %273 = arith.mulf %272, %32 : vector<6x105xf32>
    %274 = arith.addf %263, %273 : vector<6x105xf32>
    %275 = arith.mulf %272, %25 : vector<6x105xf32>
    %276 = arith.addf %265, %275 : vector<6x105xf32>
    %277 = arith.mulf %272, %16 : vector<6x105xf32>
    %278 = arith.addf %267, %277 : vector<6x105xf32>
    %279 = arith.mulf %272, %9 : vector<6x105xf32>
    %280 = arith.addf %269, %279 : vector<6x105xf32>
    %c23 = arith.constant 23 : index
    %c0_39 = arith.constant 0 : index
    %281 = vector.load %arg2[%c23, %c0_39] : memref<27x105xf32, #tpu.memory_space<vmem>>, vector<1x105xf32>
    %282 = vector.shape_cast %281 : vector<1x105xf32> to vector<1x105xf32>
    %283 = vector.broadcast %282 : vector<1x105xf32> to vector<6x105xf32>
    %284 = arith.mulf %283, %25 : vector<6x105xf32>
    %285 = arith.addf %274, %284 : vector<6x105xf32>
    %286 = arith.mulf %283, %35 : vector<6x105xf32>
    %287 = arith.addf %276, %286 : vector<6x105xf32>
    %288 = arith.mulf %283, %9 : vector<6x105xf32>
    %289 = arith.addf %278, %288 : vector<6x105xf32>
    %290 = arith.mulf %283, %19 : vector<6x105xf32>
    %291 = arith.addf %280, %290 : vector<6x105xf32>
    %c24 = arith.constant 24 : index
    %c0_40 = arith.constant 0 : index
    %292 = vector.load %arg2[%c24, %c0_40] : memref<27x105xf32, #tpu.memory_space<vmem>>, vector<1x105xf32>
    %293 = vector.shape_cast %292 : vector<1x105xf32> to vector<1x105xf32>
    %294 = vector.broadcast %293 : vector<1x105xf32> to vector<6x105xf32>
    %295 = arith.mulf %294, %6 : vector<6x105xf32>
    %296 = arith.addf %285, %295 : vector<6x105xf32>
    %297 = arith.mulf %294, %16 : vector<6x105xf32>
    %298 = arith.addf %287, %297 : vector<6x105xf32>
    %299 = arith.mulf %294, %26 : vector<6x105xf32>
    %300 = arith.addf %289, %299 : vector<6x105xf32>
    %301 = arith.mulf %294, %36 : vector<6x105xf32>
    %302 = arith.addf %291, %301 : vector<6x105xf32>
    %c25 = arith.constant 25 : index
    %c0_41 = arith.constant 0 : index
    %303 = vector.load %arg2[%c25, %c0_41] : memref<27x105xf32, #tpu.memory_space<vmem>>, vector<1x105xf32>
    %304 = vector.shape_cast %303 : vector<1x105xf32> to vector<1x105xf32>
    %305 = vector.broadcast %304 : vector<1x105xf32> to vector<6x105xf32>
    %306 = arith.mulf %305, %16 : vector<6x105xf32>
    %307 = arith.addf %296, %306 : vector<6x105xf32>
    %308 = arith.mulf %305, %9 : vector<6x105xf32>
    %309 = arith.addf %298, %308 : vector<6x105xf32>
    %310 = arith.mulf %305, %36 : vector<6x105xf32>
    %311 = arith.addf %300, %310 : vector<6x105xf32>
    %312 = arith.mulf %305, %29 : vector<6x105xf32>
    %313 = arith.addf %302, %312 : vector<6x105xf32>
    %c26 = arith.constant 26 : index
    %c0_42 = arith.constant 0 : index
    %314 = vector.load %arg2[%c26, %c0_42] : memref<27x105xf32, #tpu.memory_space<vmem>>, vector<1x105xf32>
    %315 = vector.shape_cast %314 : vector<1x105xf32> to vector<1x105xf32>
    %316 = vector.broadcast %315 : vector<1x105xf32> to vector<6x105xf32>
    %317 = arith.mulf %316, %9 : vector<6x105xf32>
    %318 = arith.addf %307, %317 : vector<6x105xf32>
    %319 = arith.mulf %316, %19 : vector<6x105xf32>
    %320 = arith.addf %309, %319 : vector<6x105xf32>
    %321 = arith.mulf %316, %29 : vector<6x105xf32>
    %322 = arith.addf %311, %321 : vector<6x105xf32>
    %323 = arith.mulf %316, %39 : vector<6x105xf32>
    %324 = arith.addf %313, %323 : vector<6x105xf32>
    %c0_43 = arith.constant 0 : index
    %c0_44 = arith.constant 0 : index
    %325 = vector.load %arg3[%c0_43, %c0_44] : memref<1x105xf32, #tpu.memory_space<vmem>>, vector<1x105xf32>
    %326 = vector.shape_cast %325 : vector<1x105xf32> to vector<1x105xf32>
    %327 = vector.broadcast %326 : vector<1x105xf32> to vector<6x105xf32>
    %328 = arith.addf %128, %327 : vector<6x105xf32>
    %329 = vector.extract_strided_slice %223 {offsets = [0, 70], sizes = [6, 35], strides = [1, 1]} : vector<6x105xf32> to vector<6x35xf32>
    %330 = vector.extract_strided_slice %223 {offsets = [0, 0], sizes = [6, 70], strides = [1, 1]} : vector<6x105xf32> to vector<6x70xf32>
    %331 = tpu.concatenate %329, %330 in 1 : vector<6x35xf32>, vector<6x70xf32> -> vector<6x105xf32>
    %332 = arith.addf %328, %331 : vector<6x105xf32>
    %333 = vector.extract_strided_slice %318 {offsets = [0, 35], sizes = [6, 70], strides = [1, 1]} : vector<6x105xf32> to vector<6x70xf32>
    %334 = vector.extract_strided_slice %318 {offsets = [0, 0], sizes = [6, 35], strides = [1, 1]} : vector<6x105xf32> to vector<6x35xf32>
    %335 = tpu.concatenate %333, %334 in 1 : vector<6x70xf32>, vector<6x35xf32> -> vector<6x105xf32>
    %336 = arith.addf %332, %335 : vector<6x105xf32>
    %337 = vector.extract_strided_slice %336 {offsets = [0, 70], sizes = [6, 35], strides = [1, 1]} : vector<6x105xf32> to vector<6x35xf32>
    %338 = vector.extract_strided_slice %336 {offsets = [0, 0], sizes = [6, 70], strides = [1, 1]} : vector<6x105xf32> to vector<6x70xf32>
    %339 = tpu.concatenate %337, %338 in 1 : vector<6x35xf32>, vector<6x70xf32> -> vector<6x105xf32>
    %340 = vector.extract_strided_slice %336 {offsets = [0, 35], sizes = [6, 70], strides = [1, 1]} : vector<6x105xf32> to vector<6x70xf32>
    %341 = vector.extract_strided_slice %336 {offsets = [0, 0], sizes = [6, 35], strides = [1, 1]} : vector<6x105xf32> to vector<6x35xf32>
    %342 = tpu.concatenate %340, %341 in 1 : vector<6x70xf32>, vector<6x35xf32> -> vector<6x105xf32>
    %343 = arith.maximumf %336, %339 : vector<6x105xf32>
    %344 = arith.maximumf %343, %342 : vector<6x105xf32>
    %345 = arith.subf %336, %344 : vector<6x105xf32>
    %346 = math.exp %345 : vector<6x105xf32>
    %347 = arith.subf %339, %344 : vector<6x105xf32>
    %348 = math.exp %347 : vector<6x105xf32>
    %349 = arith.subf %342, %344 : vector<6x105xf32>
    %350 = math.exp %349 : vector<6x105xf32>
    %351 = arith.addf %346, %348 : vector<6x105xf32>
    %352 = arith.addf %351, %350 : vector<6x105xf32>
    %353 = tpu.reciprocal %352 : vector<6x105xf32> -> vector<6x105xf32>
    %354 = arith.mulf %346, %353 : vector<6x105xf32>
    %355 = arith.addf %130, %327 : vector<6x105xf32>
    %356 = vector.extract_strided_slice %225 {offsets = [0, 70], sizes = [6, 35], strides = [1, 1]} : vector<6x105xf32> to vector<6x35xf32>
    %357 = vector.extract_strided_slice %225 {offsets = [0, 0], sizes = [6, 70], strides = [1, 1]} : vector<6x105xf32> to vector<6x70xf32>
    %358 = tpu.concatenate %356, %357 in 1 : vector<6x35xf32>, vector<6x70xf32> -> vector<6x105xf32>
    %359 = arith.addf %355, %358 : vector<6x105xf32>
    %360 = vector.extract_strided_slice %320 {offsets = [0, 35], sizes = [6, 70], strides = [1, 1]} : vector<6x105xf32> to vector<6x70xf32>
    %361 = vector.extract_strided_slice %320 {offsets = [0, 0], sizes = [6, 35], strides = [1, 1]} : vector<6x105xf32> to vector<6x35xf32>
    %362 = tpu.concatenate %360, %361 in 1 : vector<6x70xf32>, vector<6x35xf32> -> vector<6x105xf32>
    %363 = arith.addf %359, %362 : vector<6x105xf32>
    %364 = vector.extract_strided_slice %363 {offsets = [0, 70], sizes = [6, 35], strides = [1, 1]} : vector<6x105xf32> to vector<6x35xf32>
    %365 = vector.extract_strided_slice %363 {offsets = [0, 0], sizes = [6, 70], strides = [1, 1]} : vector<6x105xf32> to vector<6x70xf32>
    %366 = tpu.concatenate %364, %365 in 1 : vector<6x35xf32>, vector<6x70xf32> -> vector<6x105xf32>
    %367 = vector.extract_strided_slice %363 {offsets = [0, 35], sizes = [6, 70], strides = [1, 1]} : vector<6x105xf32> to vector<6x70xf32>
    %368 = vector.extract_strided_slice %363 {offsets = [0, 0], sizes = [6, 35], strides = [1, 1]} : vector<6x105xf32> to vector<6x35xf32>
    %369 = tpu.concatenate %367, %368 in 1 : vector<6x70xf32>, vector<6x35xf32> -> vector<6x105xf32>
    %370 = arith.maximumf %363, %366 : vector<6x105xf32>
    %371 = arith.maximumf %370, %369 : vector<6x105xf32>
    %372 = arith.subf %363, %371 : vector<6x105xf32>
    %373 = math.exp %372 : vector<6x105xf32>
    %374 = arith.subf %366, %371 : vector<6x105xf32>
    %375 = math.exp %374 : vector<6x105xf32>
    %376 = arith.subf %369, %371 : vector<6x105xf32>
    %377 = math.exp %376 : vector<6x105xf32>
    %378 = arith.addf %373, %375 : vector<6x105xf32>
    %379 = arith.addf %378, %377 : vector<6x105xf32>
    %380 = tpu.reciprocal %379 : vector<6x105xf32> -> vector<6x105xf32>
    %381 = arith.mulf %373, %380 : vector<6x105xf32>
    %382 = arith.maximumf %354, %381 : vector<6x105xf32>
    %383 = arith.addf %132, %327 : vector<6x105xf32>
    %384 = vector.extract_strided_slice %227 {offsets = [0, 70], sizes = [6, 35], strides = [1, 1]} : vector<6x105xf32> to vector<6x35xf32>
    %385 = vector.extract_strided_slice %227 {offsets = [0, 0], sizes = [6, 70], strides = [1, 1]} : vector<6x105xf32> to vector<6x70xf32>
    %386 = tpu.concatenate %384, %385 in 1 : vector<6x35xf32>, vector<6x70xf32> -> vector<6x105xf32>
    %387 = arith.addf %383, %386 : vector<6x105xf32>
    %388 = vector.extract_strided_slice %322 {offsets = [0, 35], sizes = [6, 70], strides = [1, 1]} : vector<6x105xf32> to vector<6x70xf32>
    %389 = vector.extract_strided_slice %322 {offsets = [0, 0], sizes = [6, 35], strides = [1, 1]} : vector<6x105xf32> to vector<6x35xf32>
    %390 = tpu.concatenate %388, %389 in 1 : vector<6x70xf32>, vector<6x35xf32> -> vector<6x105xf32>
    %391 = arith.addf %387, %390 : vector<6x105xf32>
    %392 = vector.extract_strided_slice %391 {offsets = [0, 70], sizes = [6, 35], strides = [1, 1]} : vector<6x105xf32> to vector<6x35xf32>
    %393 = vector.extract_strided_slice %391 {offsets = [0, 0], sizes = [6, 70], strides = [1, 1]} : vector<6x105xf32> to vector<6x70xf32>
    %394 = tpu.concatenate %392, %393 in 1 : vector<6x35xf32>, vector<6x70xf32> -> vector<6x105xf32>
    %395 = vector.extract_strided_slice %391 {offsets = [0, 35], sizes = [6, 70], strides = [1, 1]} : vector<6x105xf32> to vector<6x70xf32>
    %396 = vector.extract_strided_slice %391 {offsets = [0, 0], sizes = [6, 35], strides = [1, 1]} : vector<6x105xf32> to vector<6x35xf32>
    %397 = tpu.concatenate %395, %396 in 1 : vector<6x70xf32>, vector<6x35xf32> -> vector<6x105xf32>
    %398 = arith.maximumf %391, %394 : vector<6x105xf32>
    %399 = arith.maximumf %398, %397 : vector<6x105xf32>
    %400 = arith.subf %391, %399 : vector<6x105xf32>
    %401 = math.exp %400 : vector<6x105xf32>
    %402 = arith.subf %394, %399 : vector<6x105xf32>
    %403 = math.exp %402 : vector<6x105xf32>
    %404 = arith.subf %397, %399 : vector<6x105xf32>
    %405 = math.exp %404 : vector<6x105xf32>
    %406 = arith.addf %401, %403 : vector<6x105xf32>
    %407 = arith.addf %406, %405 : vector<6x105xf32>
    %408 = tpu.reciprocal %407 : vector<6x105xf32> -> vector<6x105xf32>
    %409 = arith.mulf %401, %408 : vector<6x105xf32>
    %410 = arith.maximumf %382, %409 : vector<6x105xf32>
    %411 = arith.addf %134, %327 : vector<6x105xf32>
    %412 = vector.extract_strided_slice %229 {offsets = [0, 70], sizes = [6, 35], strides = [1, 1]} : vector<6x105xf32> to vector<6x35xf32>
    %413 = vector.extract_strided_slice %229 {offsets = [0, 0], sizes = [6, 70], strides = [1, 1]} : vector<6x105xf32> to vector<6x70xf32>
    %414 = tpu.concatenate %412, %413 in 1 : vector<6x35xf32>, vector<6x70xf32> -> vector<6x105xf32>
    %415 = arith.addf %411, %414 : vector<6x105xf32>
    %416 = vector.extract_strided_slice %324 {offsets = [0, 35], sizes = [6, 70], strides = [1, 1]} : vector<6x105xf32> to vector<6x70xf32>
    %417 = vector.extract_strided_slice %324 {offsets = [0, 0], sizes = [6, 35], strides = [1, 1]} : vector<6x105xf32> to vector<6x35xf32>
    %418 = tpu.concatenate %416, %417 in 1 : vector<6x70xf32>, vector<6x35xf32> -> vector<6x105xf32>
    %419 = arith.addf %415, %418 : vector<6x105xf32>
    %420 = vector.extract_strided_slice %419 {offsets = [0, 70], sizes = [6, 35], strides = [1, 1]} : vector<6x105xf32> to vector<6x35xf32>
    %421 = vector.extract_strided_slice %419 {offsets = [0, 0], sizes = [6, 70], strides = [1, 1]} : vector<6x105xf32> to vector<6x70xf32>
    %422 = tpu.concatenate %420, %421 in 1 : vector<6x35xf32>, vector<6x70xf32> -> vector<6x105xf32>
    %423 = vector.extract_strided_slice %419 {offsets = [0, 35], sizes = [6, 70], strides = [1, 1]} : vector<6x105xf32> to vector<6x70xf32>
    %424 = vector.extract_strided_slice %419 {offsets = [0, 0], sizes = [6, 35], strides = [1, 1]} : vector<6x105xf32> to vector<6x35xf32>
    %425 = tpu.concatenate %423, %424 in 1 : vector<6x70xf32>, vector<6x35xf32> -> vector<6x105xf32>
    %426 = arith.maximumf %419, %422 : vector<6x105xf32>
    %427 = arith.maximumf %426, %425 : vector<6x105xf32>
    %428 = arith.subf %419, %427 : vector<6x105xf32>
    %429 = math.exp %428 : vector<6x105xf32>
    %430 = arith.subf %422, %427 : vector<6x105xf32>
    %431 = math.exp %430 : vector<6x105xf32>
    %432 = arith.subf %425, %427 : vector<6x105xf32>
    %433 = math.exp %432 : vector<6x105xf32>
    %434 = arith.addf %429, %431 : vector<6x105xf32>
    %435 = arith.addf %434, %433 : vector<6x105xf32>
    %436 = tpu.reciprocal %435 : vector<6x105xf32> -> vector<6x105xf32>
    %437 = arith.mulf %429, %436 : vector<6x105xf32>
    %438 = arith.maximumf %410, %437 : vector<6x105xf32>
    %439 = vector.extract_strided_slice %438 {offsets = [0, 0], sizes = [4, 105], strides = [1, 1]} : vector<6x105xf32> to vector<4x105xf32>
    %440 = vector.extract_strided_slice %439 {offsets = [0, 1], sizes = [4, 104], strides = [1, 1]} : vector<4x105xf32> to vector<4x104xf32>
    %441 = vector.extract_strided_slice %439 {offsets = [0, 0], sizes = [4, 1], strides = [1, 1]} : vector<4x105xf32> to vector<4x1xf32>
    %442 = tpu.concatenate %440, %441 in 1 : vector<4x104xf32>, vector<4x1xf32> -> vector<4x105xf32>
    %443 = vector.extract_strided_slice %439 {offsets = [0, 2], sizes = [4, 103], strides = [1, 1]} : vector<4x105xf32> to vector<4x103xf32>
    %444 = vector.extract_strided_slice %439 {offsets = [0, 0], sizes = [4, 2], strides = [1, 1]} : vector<4x105xf32> to vector<4x2xf32>
    %445 = tpu.concatenate %443, %444 in 1 : vector<4x103xf32>, vector<4x2xf32> -> vector<4x105xf32>
    %446 = vector.extract_strided_slice %438 {offsets = [1, 0], sizes = [4, 105], strides = [1, 1]} : vector<6x105xf32> to vector<4x105xf32>
    %447 = vector.extract_strided_slice %446 {offsets = [0, 1], sizes = [4, 104], strides = [1, 1]} : vector<4x105xf32> to vector<4x104xf32>
    %448 = vector.extract_strided_slice %446 {offsets = [0, 0], sizes = [4, 1], strides = [1, 1]} : vector<4x105xf32> to vector<4x1xf32>
    %449 = tpu.concatenate %447, %448 in 1 : vector<4x104xf32>, vector<4x1xf32> -> vector<4x105xf32>
    %450 = vector.extract_strided_slice %446 {offsets = [0, 2], sizes = [4, 103], strides = [1, 1]} : vector<4x105xf32> to vector<4x103xf32>
    %451 = vector.extract_strided_slice %446 {offsets = [0, 0], sizes = [4, 2], strides = [1, 1]} : vector<4x105xf32> to vector<4x2xf32>
    %452 = tpu.concatenate %450, %451 in 1 : vector<4x103xf32>, vector<4x2xf32> -> vector<4x105xf32>
    %453 = vector.extract_strided_slice %438 {offsets = [2, 0], sizes = [4, 105], strides = [1, 1]} : vector<6x105xf32> to vector<4x105xf32>
    %454 = vector.extract_strided_slice %453 {offsets = [0, 1], sizes = [4, 104], strides = [1, 1]} : vector<4x105xf32> to vector<4x104xf32>
    %455 = vector.extract_strided_slice %453 {offsets = [0, 0], sizes = [4, 1], strides = [1, 1]} : vector<4x105xf32> to vector<4x1xf32>
    %456 = tpu.concatenate %454, %455 in 1 : vector<4x104xf32>, vector<4x1xf32> -> vector<4x105xf32>
    %457 = vector.extract_strided_slice %453 {offsets = [0, 2], sizes = [4, 103], strides = [1, 1]} : vector<4x105xf32> to vector<4x103xf32>
    %458 = vector.extract_strided_slice %453 {offsets = [0, 0], sizes = [4, 2], strides = [1, 1]} : vector<4x105xf32> to vector<4x2xf32>
    %459 = tpu.concatenate %457, %458 in 1 : vector<4x103xf32>, vector<4x2xf32> -> vector<4x105xf32>
    %c0_45 = arith.constant 0 : index
    %c0_46 = arith.constant 0 : index
    %460 = vector.load %arg2[%c0_45, %c0_46] : memref<27x105xf32, #tpu.memory_space<vmem>>, vector<1x105xf32>
    %461 = vector.shape_cast %460 : vector<1x105xf32> to vector<1x105xf32>
    %462 = vector.broadcast %461 : vector<1x105xf32> to vector<4x105xf32>
    %463 = arith.mulf %462, %439 : vector<4x105xf32>
    %c1_47 = arith.constant 1 : index
    %c0_48 = arith.constant 0 : index
    %464 = vector.load %arg2[%c1_47, %c0_48] : memref<27x105xf32, #tpu.memory_space<vmem>>, vector<1x105xf32>
    %465 = vector.shape_cast %464 : vector<1x105xf32> to vector<1x105xf32>
    %466 = vector.broadcast %465 : vector<1x105xf32> to vector<4x105xf32>
    %467 = arith.mulf %466, %442 : vector<4x105xf32>
    %468 = arith.addf %463, %467 : vector<4x105xf32>
    %c2_49 = arith.constant 2 : index
    %c0_50 = arith.constant 0 : index
    %469 = vector.load %arg2[%c2_49, %c0_50] : memref<27x105xf32, #tpu.memory_space<vmem>>, vector<1x105xf32>
    %470 = vector.shape_cast %469 : vector<1x105xf32> to vector<1x105xf32>
    %471 = vector.broadcast %470 : vector<1x105xf32> to vector<4x105xf32>
    %472 = arith.mulf %471, %445 : vector<4x105xf32>
    %473 = arith.addf %468, %472 : vector<4x105xf32>
    %c3_51 = arith.constant 3 : index
    %c0_52 = arith.constant 0 : index
    %474 = vector.load %arg2[%c3_51, %c0_52] : memref<27x105xf32, #tpu.memory_space<vmem>>, vector<1x105xf32>
    %475 = vector.shape_cast %474 : vector<1x105xf32> to vector<1x105xf32>
    %476 = vector.broadcast %475 : vector<1x105xf32> to vector<4x105xf32>
    %477 = arith.mulf %476, %446 : vector<4x105xf32>
    %478 = arith.addf %473, %477 : vector<4x105xf32>
    %c4_53 = arith.constant 4 : index
    %c0_54 = arith.constant 0 : index
    %479 = vector.load %arg2[%c4_53, %c0_54] : memref<27x105xf32, #tpu.memory_space<vmem>>, vector<1x105xf32>
    %480 = vector.shape_cast %479 : vector<1x105xf32> to vector<1x105xf32>
    %481 = vector.broadcast %480 : vector<1x105xf32> to vector<4x105xf32>
    %482 = arith.mulf %481, %449 : vector<4x105xf32>
    %483 = arith.addf %478, %482 : vector<4x105xf32>
    %c5_55 = arith.constant 5 : index
    %c0_56 = arith.constant 0 : index
    %484 = vector.load %arg2[%c5_55, %c0_56] : memref<27x105xf32, #tpu.memory_space<vmem>>, vector<1x105xf32>
    %485 = vector.shape_cast %484 : vector<1x105xf32> to vector<1x105xf32>
    %486 = vector.broadcast %485 : vector<1x105xf32> to vector<4x105xf32>
    %487 = arith.mulf %486, %452 : vector<4x105xf32>
    %488 = arith.addf %483, %487 : vector<4x105xf32>
    %c6_57 = arith.constant 6 : index
    %c0_58 = arith.constant 0 : index
    %489 = vector.load %arg2[%c6_57, %c0_58] : memref<27x105xf32, #tpu.memory_space<vmem>>, vector<1x105xf32>
    %490 = vector.shape_cast %489 : vector<1x105xf32> to vector<1x105xf32>
    %491 = vector.broadcast %490 : vector<1x105xf32> to vector<4x105xf32>
    %492 = arith.mulf %491, %453 : vector<4x105xf32>
    %493 = arith.addf %488, %492 : vector<4x105xf32>
    %c7_59 = arith.constant 7 : index
    %c0_60 = arith.constant 0 : index
    %494 = vector.load %arg2[%c7_59, %c0_60] : memref<27x105xf32, #tpu.memory_space<vmem>>, vector<1x105xf32>
    %495 = vector.shape_cast %494 : vector<1x105xf32> to vector<1x105xf32>
    %496 = vector.broadcast %495 : vector<1x105xf32> to vector<4x105xf32>
    %497 = arith.mulf %496, %456 : vector<4x105xf32>
    %498 = arith.addf %493, %497 : vector<4x105xf32>
    %c8_61 = arith.constant 8 : index
    %c0_62 = arith.constant 0 : index
    %499 = vector.load %arg2[%c8_61, %c0_62] : memref<27x105xf32, #tpu.memory_space<vmem>>, vector<1x105xf32>
    %500 = vector.shape_cast %499 : vector<1x105xf32> to vector<1x105xf32>
    %501 = vector.broadcast %500 : vector<1x105xf32> to vector<4x105xf32>
    %502 = arith.mulf %501, %459 : vector<4x105xf32>
    %503 = arith.addf %498, %502 : vector<4x105xf32>
    %c9_63 = arith.constant 9 : index
    %c0_64 = arith.constant 0 : index
    %504 = vector.load %arg2[%c9_63, %c0_64] : memref<27x105xf32, #tpu.memory_space<vmem>>, vector<1x105xf32>
    %505 = vector.shape_cast %504 : vector<1x105xf32> to vector<1x105xf32>
    %506 = vector.broadcast %505 : vector<1x105xf32> to vector<4x105xf32>
    %507 = arith.mulf %506, %439 : vector<4x105xf32>
    %c10_65 = arith.constant 10 : index
    %c0_66 = arith.constant 0 : index
    %508 = vector.load %arg2[%c10_65, %c0_66] : memref<27x105xf32, #tpu.memory_space<vmem>>, vector<1x105xf32>
    %509 = vector.shape_cast %508 : vector<1x105xf32> to vector<1x105xf32>
    %510 = vector.broadcast %509 : vector<1x105xf32> to vector<4x105xf32>
    %511 = arith.mulf %510, %442 : vector<4x105xf32>
    %512 = arith.addf %507, %511 : vector<4x105xf32>
    %c11_67 = arith.constant 11 : index
    %c0_68 = arith.constant 0 : index
    %513 = vector.load %arg2[%c11_67, %c0_68] : memref<27x105xf32, #tpu.memory_space<vmem>>, vector<1x105xf32>
    %514 = vector.shape_cast %513 : vector<1x105xf32> to vector<1x105xf32>
    %515 = vector.broadcast %514 : vector<1x105xf32> to vector<4x105xf32>
    %516 = arith.mulf %515, %445 : vector<4x105xf32>
    %517 = arith.addf %512, %516 : vector<4x105xf32>
    %c12_69 = arith.constant 12 : index
    %c0_70 = arith.constant 0 : index
    %518 = vector.load %arg2[%c12_69, %c0_70] : memref<27x105xf32, #tpu.memory_space<vmem>>, vector<1x105xf32>
    %519 = vector.shape_cast %518 : vector<1x105xf32> to vector<1x105xf32>
    %520 = vector.broadcast %519 : vector<1x105xf32> to vector<4x105xf32>
    %521 = arith.mulf %520, %446 : vector<4x105xf32>
    %522 = arith.addf %517, %521 : vector<4x105xf32>
    %c13_71 = arith.constant 13 : index
    %c0_72 = arith.constant 0 : index
    %523 = vector.load %arg2[%c13_71, %c0_72] : memref<27x105xf32, #tpu.memory_space<vmem>>, vector<1x105xf32>
    %524 = vector.shape_cast %523 : vector<1x105xf32> to vector<1x105xf32>
    %525 = vector.broadcast %524 : vector<1x105xf32> to vector<4x105xf32>
    %526 = arith.mulf %525, %449 : vector<4x105xf32>
    %527 = arith.addf %522, %526 : vector<4x105xf32>
    %c14_73 = arith.constant 14 : index
    %c0_74 = arith.constant 0 : index
    %528 = vector.load %arg2[%c14_73, %c0_74] : memref<27x105xf32, #tpu.memory_space<vmem>>, vector<1x105xf32>
    %529 = vector.shape_cast %528 : vector<1x105xf32> to vector<1x105xf32>
    %530 = vector.broadcast %529 : vector<1x105xf32> to vector<4x105xf32>
    %531 = arith.mulf %530, %452 : vector<4x105xf32>
    %532 = arith.addf %527, %531 : vector<4x105xf32>
    %c15_75 = arith.constant 15 : index
    %c0_76 = arith.constant 0 : index
    %533 = vector.load %arg2[%c15_75, %c0_76] : memref<27x105xf32, #tpu.memory_space<vmem>>, vector<1x105xf32>
    %534 = vector.shape_cast %533 : vector<1x105xf32> to vector<1x105xf32>
    %535 = vector.broadcast %534 : vector<1x105xf32> to vector<4x105xf32>
    %536 = arith.mulf %535, %453 : vector<4x105xf32>
    %537 = arith.addf %532, %536 : vector<4x105xf32>
    %c16_77 = arith.constant 16 : index
    %c0_78 = arith.constant 0 : index
    %538 = vector.load %arg2[%c16_77, %c0_78] : memref<27x105xf32, #tpu.memory_space<vmem>>, vector<1x105xf32>
    %539 = vector.shape_cast %538 : vector<1x105xf32> to vector<1x105xf32>
    %540 = vector.broadcast %539 : vector<1x105xf32> to vector<4x105xf32>
    %541 = arith.mulf %540, %456 : vector<4x105xf32>
    %542 = arith.addf %537, %541 : vector<4x105xf32>
    %c17_79 = arith.constant 17 : index
    %c0_80 = arith.constant 0 : index
    %543 = vector.load %arg2[%c17_79, %c0_80] : memref<27x105xf32, #tpu.memory_space<vmem>>, vector<1x105xf32>
    %544 = vector.shape_cast %543 : vector<1x105xf32> to vector<1x105xf32>
    %545 = vector.broadcast %544 : vector<1x105xf32> to vector<4x105xf32>
    %546 = arith.mulf %545, %459 : vector<4x105xf32>
    %547 = arith.addf %542, %546 : vector<4x105xf32>
    %c18_81 = arith.constant 18 : index
    %c0_82 = arith.constant 0 : index
    %548 = vector.load %arg2[%c18_81, %c0_82] : memref<27x105xf32, #tpu.memory_space<vmem>>, vector<1x105xf32>
    %549 = vector.shape_cast %548 : vector<1x105xf32> to vector<1x105xf32>
    %550 = vector.broadcast %549 : vector<1x105xf32> to vector<4x105xf32>
    %551 = arith.mulf %550, %439 : vector<4x105xf32>
    %c19_83 = arith.constant 19 : index
    %c0_84 = arith.constant 0 : index
    %552 = vector.load %arg2[%c19_83, %c0_84] : memref<27x105xf32, #tpu.memory_space<vmem>>, vector<1x105xf32>
    %553 = vector.shape_cast %552 : vector<1x105xf32> to vector<1x105xf32>
    %554 = vector.broadcast %553 : vector<1x105xf32> to vector<4x105xf32>
    %555 = arith.mulf %554, %442 : vector<4x105xf32>
    %556 = arith.addf %551, %555 : vector<4x105xf32>
    %c20_85 = arith.constant 20 : index
    %c0_86 = arith.constant 0 : index
    %557 = vector.load %arg2[%c20_85, %c0_86] : memref<27x105xf32, #tpu.memory_space<vmem>>, vector<1x105xf32>
    %558 = vector.shape_cast %557 : vector<1x105xf32> to vector<1x105xf32>
    %559 = vector.broadcast %558 : vector<1x105xf32> to vector<4x105xf32>
    %560 = arith.mulf %559, %445 : vector<4x105xf32>
    %561 = arith.addf %556, %560 : vector<4x105xf32>
    %c21_87 = arith.constant 21 : index
    %c0_88 = arith.constant 0 : index
    %562 = vector.load %arg2[%c21_87, %c0_88] : memref<27x105xf32, #tpu.memory_space<vmem>>, vector<1x105xf32>
    %563 = vector.shape_cast %562 : vector<1x105xf32> to vector<1x105xf32>
    %564 = vector.broadcast %563 : vector<1x105xf32> to vector<4x105xf32>
    %565 = arith.mulf %564, %446 : vector<4x105xf32>
    %566 = arith.addf %561, %565 : vector<4x105xf32>
    %c22_89 = arith.constant 22 : index
    %c0_90 = arith.constant 0 : index
    %567 = vector.load %arg2[%c22_89, %c0_90] : memref<27x105xf32, #tpu.memory_space<vmem>>, vector<1x105xf32>
    %568 = vector.shape_cast %567 : vector<1x105xf32> to vector<1x105xf32>
    %569 = vector.broadcast %568 : vector<1x105xf32> to vector<4x105xf32>
    %570 = arith.mulf %569, %449 : vector<4x105xf32>
    %571 = arith.addf %566, %570 : vector<4x105xf32>
    %c23_91 = arith.constant 23 : index
    %c0_92 = arith.constant 0 : index
    %572 = vector.load %arg2[%c23_91, %c0_92] : memref<27x105xf32, #tpu.memory_space<vmem>>, vector<1x105xf32>
    %573 = vector.shape_cast %572 : vector<1x105xf32> to vector<1x105xf32>
    %574 = vector.broadcast %573 : vector<1x105xf32> to vector<4x105xf32>
    %575 = arith.mulf %574, %452 : vector<4x105xf32>
    %576 = arith.addf %571, %575 : vector<4x105xf32>
    %c24_93 = arith.constant 24 : index
    %c0_94 = arith.constant 0 : index
    %577 = vector.load %arg2[%c24_93, %c0_94] : memref<27x105xf32, #tpu.memory_space<vmem>>, vector<1x105xf32>
    %578 = vector.shape_cast %577 : vector<1x105xf32> to vector<1x105xf32>
    %579 = vector.broadcast %578 : vector<1x105xf32> to vector<4x105xf32>
    %580 = arith.mulf %579, %453 : vector<4x105xf32>
    %581 = arith.addf %576, %580 : vector<4x105xf32>
    %c25_95 = arith.constant 25 : index
    %c0_96 = arith.constant 0 : index
    %582 = vector.load %arg2[%c25_95, %c0_96] : memref<27x105xf32, #tpu.memory_space<vmem>>, vector<1x105xf32>
    %583 = vector.shape_cast %582 : vector<1x105xf32> to vector<1x105xf32>
    %584 = vector.broadcast %583 : vector<1x105xf32> to vector<4x105xf32>
    %585 = arith.mulf %584, %456 : vector<4x105xf32>
    %586 = arith.addf %581, %585 : vector<4x105xf32>
    %c26_97 = arith.constant 26 : index
    %c0_98 = arith.constant 0 : index
    %587 = vector.load %arg2[%c26_97, %c0_98] : memref<27x105xf32, #tpu.memory_space<vmem>>, vector<1x105xf32>
    %588 = vector.shape_cast %587 : vector<1x105xf32> to vector<1x105xf32>
    %589 = vector.broadcast %588 : vector<1x105xf32> to vector<4x105xf32>
    %590 = arith.mulf %589, %459 : vector<4x105xf32>
    %591 = arith.addf %586, %590 : vector<4x105xf32>
    %c0_99 = arith.constant 0 : index
    %c0_100 = arith.constant 0 : index
    %592 = vector.load %arg3[%c0_99, %c0_100] : memref<1x105xf32, #tpu.memory_space<vmem>>, vector<1x105xf32>
    %593 = vector.shape_cast %592 : vector<1x105xf32> to vector<1x105xf32>
    %594 = vector.broadcast %593 : vector<1x105xf32> to vector<4x105xf32>
    %595 = arith.addf %503, %594 : vector<4x105xf32>
    %596 = vector.extract_strided_slice %547 {offsets = [0, 70], sizes = [4, 35], strides = [1, 1]} : vector<4x105xf32> to vector<4x35xf32>
    %597 = vector.extract_strided_slice %547 {offsets = [0, 0], sizes = [4, 70], strides = [1, 1]} : vector<4x105xf32> to vector<4x70xf32>
    %598 = tpu.concatenate %596, %597 in 1 : vector<4x35xf32>, vector<4x70xf32> -> vector<4x105xf32>
    %599 = arith.addf %595, %598 : vector<4x105xf32>
    %600 = vector.extract_strided_slice %591 {offsets = [0, 35], sizes = [4, 70], strides = [1, 1]} : vector<4x105xf32> to vector<4x70xf32>
    %601 = vector.extract_strided_slice %591 {offsets = [0, 0], sizes = [4, 35], strides = [1, 1]} : vector<4x105xf32> to vector<4x35xf32>
    %602 = tpu.concatenate %600, %601 in 1 : vector<4x70xf32>, vector<4x35xf32> -> vector<4x105xf32>
    %603 = arith.addf %599, %602 : vector<4x105xf32>
    %cst = arith.constant 0.000000e+00 : f32
    %604 = vector.broadcast %cst : f32 to vector<4x105xf32>
    %605 = arith.cmpf oge, %603, %604 : vector<4x105xf32>
    %cst_101 = arith.constant 0.00999999977 : f32
    %606 = vector.broadcast %cst_101 : f32 to vector<4x105xf32>
    %607 = arith.mulf %606, %603 : vector<4x105xf32>
    %608 = arith.select %605, %603, %607 : vector<4x105xi1>, vector<4x105xf32>
    %c0_102 = arith.constant 0 : index
    %c0_103 = arith.constant 0 : index
    %609 = vector.load %arg4[%c0_102, %c0_103] : memref<105x128xf32, #tpu.memory_space<vmem>>, vector<105x128xf32>
    %cst_104 = arith.constant dense<0.000000e+00> : vector<4x128xf32>
    %610 = tpu.matmul %608, %609, %cst_104 {dimension_numbers = #tpu.dot_dimension_numbers<[1], [0], [0], [1], [0, 0, 1, 1], [], []>} : vector<4x105xf32>, vector<105x128xf32>, vector<4x128xf32> -> vector<4x128xf32>
    %c0_105 = arith.constant 0 : index
    %c0_106 = arith.constant 0 : index
    %611 = vector.load %arg5[%c0_105, %c0_106] : memref<1x128xf32, #tpu.memory_space<vmem>>, vector<1x128xf32>
    %612 = vector.broadcast %611 : vector<1x128xf32> to vector<4x128xf32>
    %613 = arith.addf %610, %612 : vector<4x128xf32>
    %cst_107 = arith.constant 0.000000e+00 : f32
    %614 = vector.broadcast %cst_107 : f32 to vector<4x128xf32>
    %615 = arith.cmpf oge, %613, %614 : vector<4x128xf32>
    %cst_108 = arith.constant 0.00999999977 : f32
    %616 = vector.broadcast %cst_108 : f32 to vector<4x128xf32>
    %617 = arith.mulf %616, %613 : vector<4x128xf32>
    %618 = arith.select %615, %613, %617 : vector<4x128xi1>, vector<4x128xf32>
    %c0_109 = arith.constant 0 : index
    %c0_110 = arith.constant 0 : index
    %c0_111 = arith.constant 0 : index
    %619 = vector.load %arg6[%c0_109, %c0_110, %c0_111] : memref<1x4x128xf32, #tpu.memory_space<vmem>>, vector<1x4x128xf32>
    %620 = vector.shape_cast %619 : vector<1x4x128xf32> to vector<4x128xf32>
    %621 = vector.shape_cast %618 : vector<4x128xf32> to vector<1x4x128xf32>
    tpu.vector_store %arg6[%c0_109, %c0_110, %c0_111], %621 {strides = array<i32>} : memref<1x4x128xf32, #tpu.memory_space<vmem>>, vector<1x4x128xf32>,
    return
  }
  func.func @transform_0(%arg0: i32) -> (i32, i32, i32, i32) {
    %c0_i32 = arith.constant 0 : i32
    %c0_i32_0 = arith.constant 0 : i32
    %c0_i32_1 = arith.constant 0 : i32
    %c0_i32_2 = arith.constant 0 : i32
    return %arg0, %c0_i32, %c0_i32_0, %c0_i32_1 : i32, i32, i32, i32
  }
  func.func @transform_1(%arg0: i32) -> (i32, i32) {
    %c0_i32 = arith.constant 0 : i32
    %c0_i32_0 = arith.constant 0 : i32
    %c0_i32_1 = arith.constant 0 : i32
    return %c0_i32, %c0_i32_0 : i32, i32
  }
  func.func @transform_2(%arg0: i32) -> (i32, i32) {
    %c0_i32 = arith.constant 0 : i32
    %c0_i32_0 = arith.constant 0 : i32
    %c0_i32_1 = arith.constant 0 : i32
    return %c0_i32, %c0_i32_0 : i32, i32
  }
  func.func @transform_3(%arg0: i32) -> (i32, i32) {
    %c0_i32 = arith.constant 0 : i32
    %c0_i32_0 = arith.constant 0 : i32
    %c0_i32_1 = arith.constant 0 : i32
    return %c0_i32, %c0_i32_0 : i32, i32
  }
  func.func @transform_4(%arg0: i32) -> (i32, i32) {
    %c0_i32 = arith.constant 0 : i32
    %c0_i32_0 = arith.constant 0 : i32
    %c0_i32_1 = arith.constant 0 : i32
    return %c0_i32, %c0_i32_0 : i32, i32
  }
  func.func @transform_5(%arg0: i32) -> (i32, i32, i32) {
    %c0_i32 = arith.constant 0 : i32
    %c0_i32_0 = arith.constant 0 : i32
    %c0_i32_1 = arith.constant 0 : i32
    return %arg0, %c0_i32, %c0_i32_0 : i32, i32, i32
  }
}

</mosaic_0001>

<bundles_post_ra>
// kernel: squeeze.17
= control target key start
LH: loop header
LB: loop body
LE: loop exit
PB: predicated region body
PF: predicated region fallthrough
CT: control target
= control target key end

     0   :  { %s46_s0 = inlined_call_operand.vmem [shape: f32[1,1,3,3], index: 0, kind: input, shape index: {}]   ;;  %s47_s1 = inlined_call_operand.vmem [shape: f32[1,3,3], index: 1, kind: output, shape index: {}]  }
   0x1   :  { %v4_v0 = vld [vmem:[%s46_s0] ss:$0 sm:$0xff]  ;;  %v14_v1 = vld [vmem:[%s46_s0 + $0x1] ss:$0 sm:$0xff]  ;;  %v16_v2 = vld [vmem:[%s46_s0 + $0x2] ss:$0 sm:$0xff] }
   0x2   :  { %5 = vst [vmem:[%s47_s1] sm:$0x1] %v4_v0 }
   0x3   :  { %15 = vst [vmem:[%s47_s1 + $0x1] sm:$0x1] %v14_v1 }
   0x4   :  { %17 = vst [vmem:[%s47_s1 + $0x2] sm:$0x1] %v16_v2 }

// kernel: tile.8
= control target key start
LH: loop header
LB: loop body
LE: loop exit
PB: predicated region body
PF: predicated region fallthrough
CT: control target
= control target key end

     0   :  { %s22_s0 = inlined_call_operand.vmem [shape: f32[2], index: 0, kind: input, shape index: {}]   ;;  %s23_s1 = inlined_call_operand.vmem [shape: f32[3,2], index: 1, kind: output, shape index: {}]  }
   0x1   :  { %v4_v0 = vld [vmem:[%s22_s0] ss:$0 sm:$0xff] }
   0x2   :  { %5 = vst [vmem:[%s23_s1] sm:$0xf] %v4_v0 }

// kernel: tile.9
= control target key start
LH: loop header
LB: loop body
LE: loop exit
PB: predicated region body
PF: predicated region fallthrough
CT: control target
= control target key end

     0   :  { %s30_s8 = smov 2   ;;  %vm7_vm0 = vcmask 15360   ;;  %vm13_vm1 = vcmask 48160   ;;  %vm19_vm2 = vcmask 31760   ;;  %s47_s0 = inlined_call_operand.vmem [shape: f32[3,2], index: 0, kind: input, shape index: {}]   ;;  %s48_s1 = inlined_call_operand.vmem [shape: f32[6], index: 1, kind: output, shape index: {}]  }
   0x1   :  { %v4_v0 = vld [vmem:[%s47_s0] sm:$0xf]  ;;  %s29_s0 = smov 4  }
   0x2   :  { %5 = vst [vmem:[#allocation1] sm:$0xf] %v4_v0 }
   0x9   :  { %v10_v1 = vld [vmem:[#allocation1 + $0x2] sm:$0x1]   ;;  %v16_v2 = vld [vmem:[#allocation1 + $0x1] sm:$0x1]   ;;  %v6_v3 = vld [vmem:[#allocation1] sm:$0x1]  }
   0xa   :  { %11 = vrot.lane.b32.xlu0 %v10_v1, %s29_s0  ;;  %8 = vst.msk [vmem:[#allocation0] sm:$0x1] %vm7_vm0, %v6_v3  }
  0x12   :  { %17 = vrot.lane.b32.xlu0 %v16_v2, %s30_s8 }
  0x7c   :  { %v12_v4 = vpop.permute.xlu0 %11  }
  0x7d   :  { %14 = vst.msk [vmem:[#allocation0] sm:$0x1] %vm13_vm1, %v12_v4  }
  0x84   :  { %v18_v5 = vpop.permute.xlu0 %17  }
  0x85   :  { %20 = vst.msk [vmem:[#allocation0] sm:$0x1] %vm19_vm2, %v18_v5  }
  0x8c   :  { %v23_v6 = vld [vmem:[#allocation0] sm:$0x1] }
  0x8d   :  { %26 = vst [vmem:[%s48_s1] sm:$0x1] %v23_v6 }

// kernel: cnn_block_forward.1
= control target key start
LH: loop header
LB: loop body
LE: loop exit
PB: predicated region body
PF: predicated region fallthrough
CT: control target
= control target key end

     0   :  { %s1342_s18 = smov 0   ;;  %s2200_s0 = inlined_call_operand.vmem [shape: f32[2,4,7,105], index: 0, kind: input, shape index: {}]   ;;  %s2201_s1 = inlined_call_operand.vmem [shape: f32[27,105], index: 1, kind: input, shape index: {}]   ;;  %s2202_s2 = inlined_call_operand.vmem [shape: f32[1,105], index: 2, kind: input, shape index: {}]   ;;  %s2203_s3 = inlined_call_operand.vmem [shape: f32[105,128], index: 3, kind: input, shape index: {}]   ;;  %s2204_s4 = inlined_call_operand.vmem [shape: f32[1,128], index: 4, kind: input, shape index: {}]   ;;  %s2205_s5 = inlined_call_operand.vmem [shape: f32[2,4,128], index: 5, kind: output, shape index: {}]  }
   0x1 LB: > { %s1186_s19 = sadd.s32 4294967295, %s1302_s18   ;;  %p1190_p0 = scmp.ge.s32.totalorder %s1302_s18, 1  ;;  %s1302_s18 = sphi %s1342_s18, %s15_s18  }
   0x2   : > { %p187_p1 = scmp.lt.s32.totalorder %s1302_s18, 3 }
   0x4   : > { %p188_p2 = pnand %p1190_p0, %p187_p1 }
   0x6   : > { %191 = sbr.rel (%p188_p2) target bundleno = 877 (0x36d), region = 40 }
   0xb   : > { %p214_p3 = scmp.lt.s32.totalorder %s1186_s19, 1  ;;  %s1304_s24 = smov 127   ;;  %v1383_v5 = vld [vmem:[%s2201_s1 + $0x12] ss:$0 sm:$0xff]  ;;  %v1388_v6 = vld [vmem:[%s2201_s1 + $0x9] ss:$0 sm:$0xff] }
   0xc   : > { %s1305_s25 = smov 104   ;;  %v1393_v7 = vld [vmem:[%s2201_s1 + $0xa] ss:$0 sm:$0xff]  ;;  %v1398_v8 = vld [vmem:[%s2201_s1 + $0x13] ss:$0 sm:$0xff]  ;;  %vm231_vm0 = vcmask 850944  }
   0xd   : > { %s2298_s19 = smov (!%p214_p3, %s1186_s19), 1  ;;  %v1403_v9 = vld [vmem:[%s2201_s1 + $0x15] ss:$0 sm:$0xff]  ;;  %v1408_v10 = vld [vmem:[%s2201_s1 + $0xc] ss:$0 sm:$0xff]  ;;  %s1306_s13 = smov 70  }
   0xe   : > { %s1201_s20 = sshll.u32 %s2298_s19, 5  ;;  %v1413_v11 = vld [vmem:[%s2201_s1 + $0xd] ss:$0 sm:$0xff]  ;;  %v1418_v12 = vld [vmem:[%s2201_s1 + $0x16] ss:$0 sm:$0xff]  ;;  %s1307_s14 = smov 35  }
   0xf   : > { %s218_s23 = scalar_lea.vmem %s2200_s0, %s1201_s20  ;;  %2229 = vst [vmem:[#allocation2_spill] sm:$0xff] %v1413_v11  ;;  %v1451_v25 = vld [vmem:[%s2201_s1 + $0xf] ss:$0 sm:$0xff]  ;;  %v1460_v27 = vld [vmem:[%s2201_s1 + $0x18] ss:$0 sm:$0xff]  ;;  %s1308_s15 = smov 58  }
  0x10   : > { %v1356_v0 = vld [vmem:[%s218_s23 + $0x8] sm:$0x7f]  ;;  %v1358_v1 = vld [vmem:[%s218_s23] sm:$0x7f]  ;;  %v1364_v2 = vld [vmem:[%s218_s23 + $0x10] sm:$0x7f] }
  0x11   : > { %236 = vrot.lane.b32.xlu1 %v1356_v0, %s1304_s24  ;;  %225 = vrot.lane.b32.xlu0 %v1358_v1, %s1304_s24  ;;  %v1374_v3 = vld [vmem:[%s218_s23 + $0x18] sm:$0x7f]  ;;  %2230 = vst [vmem:[#allocation3_spill] sm:$0xff] %v1418_v12  ;;  %v407_v13 = vmul.f32 %v1388_v6, %v1364_v2  ;;  %v547_v15 = vmul.f32 %v1383_v5, %v1364_v2  ;;  %v1465_v28 = vld [vmem:[%s2201_s1 + $0xb] ss:$0 sm:$0xff]  ;;  %s1309_s16 = smov 93  }
  0x12   : > { %246 = vrot.lane.b32.xlu2 %v1364_v2, %s1304_s24  ;;  %v415_v14 = vmul.f32 %v1393_v7, %v1374_v3  ;;  %v545_v16 = vmul.f32 %v1383_v5, %v1358_v1  ;;  %v1430_v17 = vmul.f32 %v1408_v10, %v1358_v1  ;;  %v555_v18 = vmul.f32 %v1398_v8, %v1374_v3  ;;  %v1473_v30 = vld [vmem:[%s2201_s1 + $0x14] ss:$0 sm:$0xff]  ;;  %v1481_v35 = vld [vmem:[%s2201_s1 + $0x19] ss:$0 sm:$0xff]  ;;  %v1488_v37 = vld [vmem:[%s2201_s1 + $0x10] ss:$0 sm:$0xff] }
  0x13   : > { %v1436_v19 = vmul.f32 %v1403_v9, %v1358_v1  ;;  %v551_v21 = vmul.f32 %v1398_v8, %v1356_v0  ;;  %v405_v22 = vmul.f32 %v1388_v6, %v1358_v1  ;;  %v411_v23 = vmul.f32 %v1393_v7, %v1356_v0  ;;  %2231 = vst [vmem:[#allocation4_spill] sm:$0xff] %v1451_v25  ;;  %v1499_v41 = vld [vmem:[%s2201_s1 + $0x1a] ss:$0 sm:$0xff]  ;;  %v1504_v42 = vld [vmem:[%s2201_s1 + $0x11] ss:$0 sm:$0xff]  ;;  %s1310_s21 = smov 126  }
  0x14   : > { %v1446_v24 = vmul.f32 %v1413_v11, %v1356_v0  ;;  %v1455_v26 = vmul.f32 %v1418_v12, %v1356_v0  ;;  %v416_v31 = vadd.f32 %v415_v14, %v407_v13  ;;  %v437_v32 = vrot.slane %v1430_v17, 1  ;;  %2232 = vst [vmem:[#allocation5_spill] sm:$0xff] %v1481_v35  ;;  %v1550_v55 = vld [vmem:[%s2201_s1 + $0x17] ss:$0 sm:$0xff]  ;;  %v1563_v58 = vld [vmem:[%s2201_s1 + $0xe] ss:$0 sm:$0xff] }
  0x15   : > { %v556_v33 = vadd.f32 %v555_v18, %v547_v15  ;;  %v1476_v34 = vadd.f32 %v551_v21, %v545_v16  ;;  %v1483_v36 = vadd.f32 %v411_v23, %v405_v22  ;;  %2233 = vst [vmem:[#allocation6_spill] sm:$0xff] %v1488_v37  ;;  %v577_v39 = vrot.slane %v1436_v19, 1  ;;  %v1591_v16 = vld [vmem:[%s2201_s1] ss:$0 sm:$0xff]  ;;  %v1596_v17 = vld [vmem:[%s2201_s1 + $0x1] ss:$0 sm:$0xff] }
  0x16   : > { %v1494_v40 = vmul.f32 %v1403_v9, %v1364_v2  ;;  %v1508_v43 = vmul.f32 %v1451_v25, %v1364_v2  ;;  %v1513_v45 = vmul.f32 %v1388_v6, %v1356_v0  ;;  %v1517_v46 = vmul.f32 %v1408_v10, %v1364_v2  ;;  %2242 = vst [vmem:[#allocation15_spill] sm:$0xff] %v1591_v16  ;;  %v1624_v23 = vld [vmem:[%s2201_s1 + $0x4] ss:$0 sm:$0xff]  ;;  %s1311_s22 = smov 103   ;;  %s1193_s26 = sshll.u32 %s2298_s19, 2 }
  0x17   : > { %v1523_v48 = vmul.f32 %v1488_v37, %v1374_v3  ;;  %v1527_v49 = vmul.f32 %v1460_v27, %v1364_v2  ;;  %v1531_v50 = vmul.f32 %v1460_v27, %v1358_v1  ;;  %v1537_v52 = vmul.f32 %v1481_v35, %v1374_v3 }
  0x18   : > { %2234 = vst [vmem:[#allocation7_spill] sm:$0xff] %v1508_v43  ;;  %v1541_v53 = vmul.f32 %v1383_v5, %v1356_v0  ;;  %v1545_v54 = vmul.f32 %v1418_v12, %v1374_v3  ;;  %v1554_v56 = vmul.f32 %v1481_v35, %v1356_v0  ;;  %v1558_v57 = vmul.f32 %v1413_v11, %v1374_v3 }
  0x19   : > { %239 = vrot.lane.b32.xlu1 %v1356_v0, %s1305_s25  ;;  %228 = vrot.lane.b32.xlu0 %v1358_v1, %s1305_s25  ;;  %2235 = vst [vmem:[#allocation8_spill] sm:$0xff] %v1523_v48  ;;  %v1567_v59 = vmul.f32 %v1451_v25, %v1358_v1  ;;  %v1571_v60 = vmul.f32 %v1488_v37, %v1356_v0  ;;  %v2249_v37 = vrot.slane %v1446_v24, 1  ;;  %vm695_vm1 = vcmask 285696  }
  0x1a   : > { %249 = vrot.lane.b32.xlu2 %v1364_v2, %s1305_s25  ;;  %2236 = vst [vmem:[#allocation9_spill] sm:$0xff] %v1527_v49  ;;  %v1586_v15 = vmul.f32 %v1408_v10, %v1374_v3  ;;  %v1602_v21 = vmul.f32 %v1451_v25, %v1356_v0  ;;  %v1660_v35 = vmul.f32 %v1403_v9, %v1356_v0  ;;  %vm705_vm2 = vcmask 572416  }
  0x1b   : > { %2237 = vst [vmem:[#allocation10_spill] sm:$0xff] %v1537_v52  ;;  %v408_v25 = vmul.f32 %v1388_v6, %v1374_v3  ;;  %v271_v38 = vmul.f32 %v1596_v17, %v1356_v0  ;;  %v1681_v6 = vmul.f32 %v1624_v23, %v1356_v0 }
  0x1c   : > { %2238 = vst [vmem:[#allocation11_spill] sm:$0xff] %v1554_v56 }
  0x1d   : > { %2239 = vst [vmem:[#allocation12_spill] sm:$0xff] %v1571_v60  ;;  %v2250_v60 = vrot.slane %v1455_v26, 1 }
  0x1e   : > { %2243 = vst [vmem:[#allocation16_spill] sm:$0xff] %v1602_v21  ;;  %v1686_v21 = vld [vmem:[%s2201_s1 + $0x6] ss:$0 sm:$0xff] }
  0x21   : > { %259 = vrot.lane.b32.xlu1 %v1374_v3, %s1305_s25  ;;  %256 = vrot.lane.b32.xlu0 %v1374_v3, %s1304_s24 }
  0x6c   : > { %v247_v4 = vpop.permute.xlu2 %246 }
  0x74   : > { %v250_v20 = vpop.permute.xlu2 %249 }
  0x75   : > { %v1468_v29 = vsel %vm231_vm0, %v247_v4, %v250_v20  ;;  %v1633_v20 = vld [vmem:[%s2201_s1 + $0x2] ss:$0 sm:$0xff] }
  0x76   : > { %v425_v47 = vmul.f32 %v1465_v28, %v1468_v29  ;;  %v565_v51 = vmul.f32 %v1473_v30, %v1468_v29  ;;  %v1576_v62 = vmul.f32 %v1504_v42, %v1468_v29  ;;  %v1580_v63 = vmul.f32 %v1499_v41, %v1468_v29  ;;  %2245 = vst [vmem:[#allocation18_spill] sm:$0xff] %v1633_v20 }
  0x77   : > { %v1606_v22 = vmul.f32 %v1550_v55, %v1468_v29  ;;  %v1619_v13 = vmul.f32 %v1413_v11, %v1468_v29  ;;  %v1652_v11 = vmul.f32 %v1460_v27, %v1356_v0  ;;  %v1739_v49 = vmul.f32 %v1624_v23, %v1468_v29 }
  0x78   : > { %2240 = vst [vmem:[#allocation13_spill] sm:$0xff] %v1576_v62  ;;  %v426_v4 = vadd.f32 %v425_v47, %v416_v31  ;;  %v566_v19 = vadd.f32 %v565_v51, %v556_v33  ;;  %v1611_v31 = vmul.f32 %v1563_v58, %v1468_v29  ;;  %v1628_v47 = vmul.f32 %v1403_v9, %v1374_v3  ;;  %v1638_v51 = vld [vmem:[%s2201_s1 + $0x3] ss:$0 sm:$0xff]  ;;  %v1643_v33 = vld [vmem:[%s2201_s1 + $0x8] ss:$0 sm:$0xff] }
  0x79   : > { %2241 = vst [vmem:[#allocation14_spill] sm:$0xff] %v1580_v63  ;;  %v548_v63 = vmul.f32 %v1383_v5, %v1374_v3  ;;  %v557_v62 = vmul.f32 %v1398_v8, %v1468_v29  ;;  %v1673_v5 = vmul.f32 %v1418_v12, %v1468_v29  ;;  %v265_v9 = vmul.f32 %v1591_v16, %v1358_v1 }
  0x7a   : > { %v439_v18 = vadd.f32 %v437_v32, %v426_v4  ;;  %2244 = vst [vmem:[#allocation17_spill] sm:$0xff] %v1628_v47  ;;  %v267_v32 = vmul.f32 %v1591_v16, %v1364_v2  ;;  %v275_v4 = vmul.f32 %v1596_v17, %v1374_v3  ;;  %v579_v44 = vadd.f32 %v577_v39, %v566_v19  ;;  %v1669_v19 = vld [vmem:[%s2201_s1 + $0x5] ss:$0 sm:$0xff] }
  0x7b   : > { %2246 = vst [vmem:[#allocation19_spill] sm:$0xff] %v1643_v33  ;;  %v417_v39 = vmul.f32 %v1393_v7, %v1468_v29  ;;  %v285_v12 = vmul.f32 %v1633_v20, %v1468_v29  ;;  %v295_v48 = vmul.f32 %v1638_v51, %v1358_v1  ;;  %v1712_v43 = vmul.f32 %v1669_v19, %v1468_v29 }
  0x7c   : > { %2247 = vst [vmem:[#allocation20_spill] sm:$0xff] %v1673_v5  ;;  %v276_v52 = vadd.f32 %v275_v4, %v267_v32  ;;  %v1692_v5 = vmul.f32 %v1643_v33, %v1468_v29  ;;  %v455_v47 = vadd.f32 %v2249_v37, %v439_v18  ;;  %v595_v56 = vadd.f32 %v2250_v60, %v579_v44 }
  0x7d   : > { %v1703_v32 = vmul.f32 %v1408_v10, %v1356_v0  ;;  %v1705_v4 = vadd.f32 %v557_v62, %v548_v63  ;;  %v1708_v20 = vadd.f32 %v417_v39, %v408_v25  ;;  %2252 = vst [vmem:[#allocation23_spill] sm:$0xff] %v1712_v43  ;;  %v1716_v24 = vmul.f32 %v1638_v51, %v1364_v2  ;;  %v1760_v63 = vld [vmem:[%s2201_s1 + $0x7] ss:$0 sm:$0xff] }
  0x7e   : > { %2248 = vst [vmem:[#allocation21_spill] sm:$0xff] %v1692_v5  ;;  %v1718_v26 = vadd.f32 %v271_v38, %v265_v9  ;;  %v1723_v10 = vmul.f32 %v1591_v16, %v1356_v0  ;;  %v286_v25 = vadd.f32 %v285_v12, %v276_v52  ;;  %v1727_v62 = vmul.f32 %v1686_v21, %v1364_v2 }
  0x7f   : > { %2251 = vst [vmem:[#allocation22_spill] sm:$0xff] %v1703_v32  ;;  %v297_v18 = vrot.slane %v295_v48, 1  ;;  %v268_v48 = vmul.f32 %v1591_v16, %v1374_v3  ;;  %v277_v52 = vmul.f32 %v1596_v17, %v1468_v29  ;;  %v1766_v37 = vmul.f32 %v1624_v23, %v1374_v3 }
  0x80   : > { %2253 = vst [vmem:[#allocation24_spill] sm:$0xff] %v1739_v49  ;;  %v1772_v43 = vmul.f32 %v1760_v63, %v1374_v3 }
  0x83   : > { %v237_v14 = vpop.permute.xlu1 %236  ;;  %v226_v61 = vpop.permute.xlu0 %225 }
  0x8b   : > { %v240_v44 = vpop.permute.xlu1 %239  ;;  %v229_v60 = vpop.permute.xlu0 %228 }
  0x8c   : > { %v1731_v39 = vsel %vm231_vm0, %v237_v14, %v240_v44  ;;  %v1734_v38 = vsel %vm231_vm0, %v226_v61, %v229_v60 }
  0x8d   : > { %v561_v12 = vmul.f32 %v1473_v30, %v1734_v38  ;;  %v421_v2 = vmul.f32 %v1465_v28, %v1734_v38  ;;  %v467_v61 = vmul.f32 %v1563_v58, %v1734_v38  ;;  %v607_v14 = vmul.f32 %v1550_v55, %v1734_v38 }
  0x8e   : > { %v413_v44 = vmul.f32 %v1393_v7, %v1734_v38  ;;  %v423_v60 = vmul.f32 %v1465_v28, %v1731_v39 }
  0x8f   : > { %v562_v9 = vadd.f32 %v561_v12, %v1476_v34  ;;  %v422_v33 = vadd.f32 %v421_v2, %v1483_v36  ;;  %v469_v5 = vrot.slane %v467_v61, 1  ;;  %v609_v7 = vrot.slane %v607_v14, 1 }
  0x90   : > { %v414_v49 = vadd.f32 %v413_v44, %v1513_v45  ;;  %v553_v36 = vmul.f32 %v1398_v8, %v1734_v38  ;;  %v299_v12 = vadd.f32 %v297_v18, %v286_v25  ;;  %v663_v2 = vmul.f32 %v1499_v41, %v1734_v38 }
  0x91   : > { %v572_v32 = vadd.f32 %v1494_v40, %v562_v9  ;;  %v432_v34 = vadd.f32 %v1517_v46, %v422_v33  ;;  %v1782_v61 = vmul.f32 %v1638_v51, %v1374_v3  ;;  %v1784_v45 = vadd.f32 %v277_v52, %v268_v48 }
  0x92   : > { %v424_v16 = vadd.f32 %v423_v60, %v414_v49  ;;  %v523_v8 = vmul.f32 %v1504_v42, %v1734_v38  ;;  %v554_v33 = vadd.f32 %v553_v36, %v1541_v53  ;;  %v471_v49 = vadd.f32 %v469_v5, %v455_v47 }
  0x93   : > { %v260_v14 = vpop.permute.xlu1 %259  ;;  %v257_v44 = vpop.permute.xlu0 %256  ;;  %v588_v40 = vadd.f32 %v1545_v54, %v572_v32  ;;  %v448_v46 = vadd.f32 %v1558_v57, %v432_v34  ;;  %v611_v18 = vadd.f32 %v609_v7, %v595_v56  ;;  %v563_v57 = vmul.f32 %v1473_v30, %v1731_v39  ;;  %v2256_v7 = vld [vmem:[#allocation7_spill] sm:$0xff] }
  0x94   : > { %v1792_v25 = vsel %vm231_vm0, %v257_v44, %v260_v14  ;;  %v434_v9 = vadd.f32 %v1586_v15, %v424_v16  ;;  %v1804_v53 = vmul.f32 %v1460_v27, %v1374_v3  ;;  %v1808_v56 = vmul.f32 %v1686_v21, %v1358_v1  ;;  %v2258_v1 = vld [vmem:[#allocation9_spill] sm:$0xff] }
  0x95   : > { %v604_v48 = vadd.f32 %v1606_v22, %v588_v40  ;;  %v464_v52 = vadd.f32 %v1611_v31, %v448_v46  ;;  %v465_v54 = vmul.f32 %v1563_v58, %v1792_v25  ;;  %v373_v15 = vrot.slane %v1772_v43, 1  ;;  %v2260_v40 = vld [vmem:[#allocation11_spill] sm:$0xff] }
  0x96   : > { %v450_v32 = vadd.f32 %v1619_v13, %v434_v9  ;;  %v2254_v16 = vrot.slane %v1531_v50, 1  ;;  %v2255_v31 = vrot.slane %v1567_v59, 1  ;;  %v564_v5 = vadd.f32 %v563_v57, %v554_v33  ;;  %v2262_v9 = vld [vmem:[#allocation12_spill] sm:$0xff]  ;;  %v2264_v33 = vld [vmem:[#allocation17_spill] sm:$0xff] }
  0x97   : > { %v1817_v13 = vmul.f32 %v1760_v63, %v1356_v0  ;;  %v665_v60 = vrot.slane %v663_v2, 1  ;;  %v525_v27 = vrot.slane %v523_v8, 1  ;;  %v2257_v34 = vrot.slane %v2256_v7, 1 }
  0x98   : > { %v623_v22 = vadd.f32 %v2254_v16, %v604_v48  ;;  %v483_v47 = vadd.f32 %v2255_v31, %v464_v52  ;;  %v2259_v14 = vrot.slane %v2258_v1, 1  ;;  %v2261_v46 = vrot.slane %v2260_v40, 1  ;;  %v2265_v16 = vld [vmem:[#allocation6_spill] sm:$0xff] }
  0x99   : > { %v493_v36 = vadd.f32 %v2257_v34, %v471_v49  ;;  %v2263_v48 = vrot.slane %v2262_v9, 1  ;;  %v466_v52 = vadd.f32 %v465_v54, %v450_v32  ;;  %v574_v57 = vadd.f32 %v2264_v33, %v564_v5 }
  0x9a   : > { %v633_v44 = vadd.f32 %v2259_v14, %v611_v18  ;;  %v645_v50 = vadd.f32 %v2261_v46, %v623_v22  ;;  %v506_v31 = vmul.f32 %v2265_v16, %v1734_v38  ;;  %v567_v2 = vmul.f32 %v1473_v30, %v1792_v25  ;;  %v2269_v30 = vld [vmem:[#allocation10_spill] sm:$0xff]  ;;  %v2273_v46 = vld [vmem:[#allocation20_spill] sm:$0xff] }
  0x9b   : > { %v505_v59 = vadd.f32 %v2263_v48, %v483_v47  ;;  %v2266_v8 = vrot.slane %v1681_v6, 1  ;;  %v1836_v18 = vmul.f32 %v1686_v21, %v1356_v0  ;;  %v528_v54 = vmul.f32 %v1504_v42, %v1731_v39  ;;  %v2267_v47 = vld [vmem:[#allocation8_spill] sm:$0xff] }
  0x9c   : > { %v667_v22 = vadd.f32 %v665_v60, %v645_v50  ;;  %v1842_v32 = vmul.f32 %v1760_v63, %v1468_v29  ;;  %v2268_v5 = vrot.slane %v2267_v47, 1  ;;  %v2270_v1 = vrot.slane %v2269_v30, 1  ;;  %v2271_v60 = vld [vmem:[#allocation16_spill] sm:$0xff] }
  0x9d   : > { %v315_v49 = vadd.f32 %v2266_v8, %v299_v12  ;;  %v527_v7 = vadd.f32 %v525_v27, %v505_v59  ;;  %v341_v14 = vrot.slane %v1808_v56, 1  ;;  %v2272_v27 = vrot.slane %v2271_v60, 1  ;;  %v2274_v59 = vld [vmem:[#allocation4_spill] sm:$0xff] }
  0x9e   : > { %v515_v34 = vadd.f32 %v2268_v5, %v493_v36  ;;  %v655_v6 = vadd.f32 %v2270_v1, %v633_v44  ;;  %702 = vrot.lane.b32.xlu1 %v667_v22, %s1306_s13  ;;  %v590_v50 = vadd.f32 %v2273_v46, %v574_v57  ;;  %v605_v36 = vmul.f32 %v1550_v55, %v1792_v25  ;;  %v2275_v57 = vld [vmem:[#allocation5_spill] sm:$0xff]  ;;  %v2276_v5 = vld [vmem:[#allocation3_spill] sm:$0xff] }
  0x9f   : > { %692 = vrot.lane.b32.xlu0 %v527_v7, %s1307_s14  ;;  %v488_v40 = vadd.f32 %v2272_v27, %v466_v52  ;;  %689 = vrot.lane.b32.xlu2 %v527_v7, %s1308_s15  ;;  %v508_v9 = vrot.slane %v506_v31, 1  ;;  %v568_v48 = vadd.f32 %v567_v2, %v1705_v4  ;;  %v1862_v33 = vmul.f32 %v2274_v59, %v1374_v3  ;;  %v2277_v31 = vld [vmem:[#allocation13_spill] sm:$0xff]  ;;  %v2279_v2 = vld [vmem:[#allocation14_spill] sm:$0xff] }
  0xa0   : > { %v530_v52 = vrot.slane %v528_v54, 1  ;;  %v1867_v47 = vmul.f32 %v2275_v57, %v1734_v38  ;;  %v596_v30 = vmul.f32 %v2276_v5, %v1734_v38  ;;  %v427_v7 = vmul.f32 %v1465_v28, %v1792_v25  ;;  %v2281_v54 = vld [vmem:[#allocation18_spill] sm:$0xff] }
  0xa1   : > { %v2278_v1 = vrot.slane %v2277_v31, 1  ;;  %v2280_v60 = vrot.slane %v2279_v2, 1  ;;  %v1879_v46 = vmul.f32 %v1499_v41, %v1731_v39  ;;  %v281_v59 = vmul.f32 %v2281_v54, %v1734_v38 }
  0xa2   : > { %v510_v12 = vadd.f32 %v508_v9, %v488_v40  ;;  %v606_v8 = vadd.f32 %v605_v36, %v590_v50  ;;  %v1885_v5 = vmul.f32 %v1550_v55, %v1731_v39  ;;  %v327_v28 = vmul.f32 %v1669_v19, %v1734_v38 }
  0xa3   : > { %v537_v4 = vadd.f32 %v2278_v1, %v515_v34  ;;  %v677_v27 = vadd.f32 %v2280_v60, %v655_v6  ;;  %v2282_v34 = vrot.slane %v1660_v35, 1  ;;  %v2283_v6 = vld [vmem:[#allocation2_spill] sm:$0xff]  ;;  %v282_v2 = vadd.f32 %v281_v59, %v1718_v26 }
  0xa4   : > { %v456_v1 = vmul.f32 %v2283_v6, %v1734_v38  ;;  %v273_v60 = vmul.f32 %v1596_v17, %v1734_v38  ;;  %v648_v40 = vrot.slane %v1867_v47, 1  ;;  %v598_v50 = vrot.slane %v596_v30, 1 }
  0xa5   : > { %v584_v31 = vadd.f32 %v2282_v34, %v568_v48  ;;  %v428_v36 = vadd.f32 %v427_v7, %v1708_v20  ;;  %v329_v9 = vrot.slane %v327_v28, 1  ;;  %v472_v44 = vmul.f32 %v1563_v58, %v1731_v39  ;;  %v2285_v28 = vld [vmem:[#allocation22_spill] sm:$0xff] }
  0xa6   : > { %v292_v35 = vadd.f32 %v1716_v24, %v282_v2  ;;  %v274_v48 = vadd.f32 %v273_v60, %v1723_v10  ;;  %v283_v34 = vmul.f32 %v2281_v54, %v1731_v39  ;;  %816 = vrot.lane.b32.xlu1 %v537_v4, %s1308_s15  ;;  %v1906_v26 = vadd.f32 %v530_v52, %v510_v12 }
  0xa7   : > { %699 = vrot.lane.b32.xlu0 %v667_v22, %s1309_s16  ;;  %v2284_v20 = vrot.slane %v1652_v11, 1  ;;  %v614_v30 = vrot.slane %v1885_v5, 1  ;;  %v331_v58 = vadd.f32 %v329_v9, %v315_v49  ;;  %819 = vrot.lane.b32.xlu2 %v537_v4, %s1307_s14  ;;  %v600_v24 = vadd.f32 %v598_v50, %v584_v31  ;;  %v2287_v22 = vld [vmem:[#allocation19_spill] sm:$0xff] }
  0xa8   : > { %v458_v10 = vrot.slane %v456_v1, 1  ;;  %v308_v7 = vadd.f32 %v1766_v37, %v292_v35  ;;  %v284_v59 = vadd.f32 %v283_v34, %v274_v48  ;;  %v2286_v6 = vrot.slane %v2285_v28, 1  ;;  %v2289_v5 = vld [vmem:[#allocation23_spill] sm:$0xff]  ;;  %v2291_v48 = vld [vmem:[#allocation21_spill] sm:$0xff] }
  0xa9   : > { %v628_v47 = vadd.f32 %v2284_v20, %v606_v8  ;;  %v383_v12 = vmul.f32 %v2287_v22, %v1734_v38  ;;  %v2288_v52 = vrot.slane %v1727_v62, 1  ;;  %v287_v8 = vmul.f32 %v2281_v54, %v1792_v25 }
  0xaa   : > { %v444_v2 = vadd.f32 %v2286_v6, %v428_v36  ;;  %v474_v49 = vrot.slane %v472_v44, 1  ;;  %v324_v4 = vadd.f32 %v2289_v5, %v308_v7  ;;  %v294_v31 = vadd.f32 %v1782_v61, %v284_v59  ;;  %v2290_v36 = vld [vmem:[#allocation24_spill] sm:$0xff] }
  0xab   : > { %v353_v11 = vadd.f32 %v2288_v52, %v331_v58  ;;  %v325_v37 = vmul.f32 %v1669_v19, %v1792_v25  ;;  %v366_v60 = vmul.f32 %v1760_v63, %v1734_v38  ;;  %v388_v62 = vmul.f32 %v2287_v22, %v1731_v39 }
  0xac   : > { %v288_v50 = vadd.f32 %v287_v8, %v1784_v45  ;;  %v343_v44 = vadd.f32 %v341_v14, %v324_v4  ;;  %v310_v9 = vadd.f32 %v2290_v36, %v294_v31  ;;  %v300_v61 = vmul.f32 %v1638_v51, %v1356_v0 }
  0xad   : > { %v375_v1 = vadd.f32 %v373_v15, %v353_v11  ;;  %v316_v43 = vmul.f32 %v1624_v23, %v1734_v38  ;;  %v460_v15 = vadd.f32 %v458_v10, %v444_v2  ;;  %v385_v35 = vrot.slane %v383_v12, 1 }
  0xae   : > { %v2292_v34 = vrot.slane %v2291_v48, 1  ;;  %v332_v45 = vmul.f32 %v1669_v19, %v1731_v39  ;;  %v2293_v56 = vrot.slane %v1817_v13, 1  ;;  %v326_v58 = vadd.f32 %v325_v37, %v310_v9  ;;  %828 = vrot.lane.b32.xlu1 %v677_v27, %s1306_s13 }
  0xaf   : > { %v302_v7 = vrot.slane %v300_v61, 1  ;;  %v354_v0 = vmul.f32 %v1686_v21, %v1374_v3  ;;  %825 = vrot.lane.b32.xlu0 %v677_v27, %s1309_s16  ;;  %v670_v38 = vrot.slane %v1879_v46, 1  ;;  %v368_v10 = vrot.slane %v366_v60, 1  ;;  %756 = vrot.lane.b32.xlu2 %v1906_v26, %s1307_s14 }
  0xb0   : > { %v1941_v20 = vadd.f32 %v2292_v34, %v375_v1  ;;  %v365_v14 = vadd.f32 %v2293_v56, %v343_v44  ;;  %v390_v59 = vrot.slane %v388_v62, 1  ;;  %v318_v28 = vrot.slane %v316_v43, 1 }
  0xb1   : > { %v2294_v13 = vrot.slane %v1836_v18, 1  ;;  %v304_v2 = vadd.f32 %v302_v7, %v288_v50  ;;  %v334_v12 = vrot.slane %v332_v45, 1  ;;  %v650_v52 = vadd.f32 %v648_v40, %v628_v47 }
  0xb2   : > { %v387_v39 = vadd.f32 %v385_v35, %v365_v14  ;;  %v616_v3 = vadd.f32 %v614_v30, %v600_v24  ;;  %v476_v11 = vadd.f32 %v474_v49, %v460_v15  ;;  %v496_v8 = vrot.slane %v1862_v33, 1  ;;  %v1981_v15 = vld [vmem:[%s2202_s2] ss:$0 sm:$0xff] }
  0xb3   : > { %v348_v6 = vadd.f32 %v2294_v13, %v326_v58  ;;  %v320_v5 = vadd.f32 %v318_v28, %v304_v2  ;;  %v356_v46 = vrot.slane %v354_v0, 1  ;;  %v398_v4 = vmul.f32 %v2287_v22, %v1792_v25 }
  0xb4   : > { %v656_v31 = vmul.f32 %v2275_v57, %v1468_v29  ;;  %v516_v18 = vmul.f32 %v2265_v16, %v1468_v29  ;;  %v678_v37 = vmul.f32 %v1499_v41, %v1792_v25  ;;  %v672_v30 = vadd.f32 %v670_v38, %v650_v52 }
  0xb5   : > { %v370_v27 = vadd.f32 %v368_v10, %v348_v6  ;;  %v336_v47 = vadd.f32 %v334_v12, %v320_v5  ;;  %v2295_v33 = vrot.slane %v1804_v53, 1  ;;  %v498_v49 = vadd.f32 %v496_v8, %v476_v11 }
  0xb6   : > { %v538_v1 = vmul.f32 %v1504_v42, %v1792_v25  ;;  %v378_v62 = vrot.slane %v1842_v32, 1  ;;  %v400_v57 = vrot.slane %v398_v4, 1  ;;  %753 = vrot.lane.b32.xlu1 %v1906_v26, %s1308_s15  ;;  %v658_v29 = vrot.slane %v656_v31, 1 }
  0xb7   : > { %v392_v40 = vadd.f32 %v390_v59, %v370_v27  ;;  %v638_v24 = vadd.f32 %v2295_v33, %v616_v3  ;;  %v358_v60 = vadd.f32 %v356_v46, %v336_v47  ;;  %765 = vrot.lane.b32.xlu0 %v672_v30, %s1306_s13  ;;  %v518_v41 = vrot.slane %v516_v18, 1  ;;  %762 = vrot.lane.b32.xlu2 %v672_v30, %s1309_s16 }
  0xb8   : > { %v680_v50 = vrot.slane %v678_v37, 1  ;;  %v540_v36 = vrot.slane %v538_v1, 1  ;;  %v687_v48 = vadd.f32 %v1981_v15, %v387_v39  ;;  %v814_v38 = vadd.f32 %v1981_v15, %v1941_v20 }
  0xb9   : > { %v380_v16 = vadd.f32 %v378_v62, %v358_v60  ;;  %v660_v53 = vadd.f32 %v658_v29, %v638_v24  ;;  %v520_v44 = vadd.f32 %v518_v41, %v498_v49  ;;  %v751_v2 = vadd.f32 %v1981_v15, %v392_v40 }
  0xbb   : > { %v402_v9 = vadd.f32 %v400_v57, %v380_v16  ;;  %v682_v42 = vadd.f32 %v680_v50, %v660_v53  ;;  %v542_v25 = vadd.f32 %v540_v36, %v520_v44 }
  0xbd   : > { %v877_v4 = vadd.f32 %v1981_v15, %v402_v9 }
  0xbe   : > { %888 = vrot.lane.b32.xlu1 %v682_v42, %s1309_s16 }
  0xbf   : > { %882 = vrot.lane.b32.xlu0 %v542_v25, %s1307_s14  ;;  %879 = vrot.lane.b32.xlu2 %v542_v25, %s1308_s15 }
  0xc7   : > { %891 = vrot.lane.b32.xlu2 %v682_v42, %s1306_s13 }
  0xf9   : > { %v690_v32 = vpop.permute.xlu2 %689 }
 0x101   : > { %v820_v26 = vpop.permute.xlu2 %819 }
 0x109   : > { %v757_v58 = vpop.permute.xlu2 %756 }
 0x110   : > { %v703_v61 = vpop.permute.xlu1 %702 }
 0x111   : > { %v693_v43 = vpop.permute.xlu0 %692  ;;  %v763_v6 = vpop.permute.xlu2 %762 }
 0x112   : > { %v696_v35 = vsel %vm695_vm1, %v690_v32, %v693_v43 }
 0x113   : > { %v697_v34 = vadd.f32 %v696_v35, %v687_v48 }
 0x118   : > { %v817_v45 = vpop.permute.xlu1 %816 }
 0x119   : > { %v700_v56 = vpop.permute.xlu0 %699  ;;  %v822_v0 = vsel %vm695_vm1, %v817_v45, %v820_v26  ;;  %v880_v27 = vpop.permute.xlu2 %879 }
 0x11a   : > { %v706_v14 = vsel %vm705_vm2, %v700_v56, %v703_v61  ;;  %v823_v10 = vadd.f32 %v822_v0, %v814_v38 }
 0x11b   : > { %v707_v7 = vadd.f32 %v706_v14, %v697_v34 }
 0x11d   : > { %719 = vrot.lane.b32.xlu2 %v707_v7, %s1306_s13  ;;  %712 = vrot.lane.b32.xlu1 %v707_v7, %s1307_s14 }
 0x11e   : > { %709 = vrot.lane.b32.xlu0 %v707_v7, %s1308_s15 }
 0x120   : > { %v829_v59 = vpop.permute.xlu1 %828 }
 0x121   : > { %v826_v28 = vpop.permute.xlu0 %825  ;;  %v892_v37 = vpop.permute.xlu2 %891 }
 0x122   : > { %v831_v39 = vsel %vm705_vm2, %v826_v28, %v829_v59 }
 0x123   : > { %v832_v13 = vadd.f32 %v831_v39, %v823_v10 }
 0x125   : > { %834 = vrot.lane.b32.xlu2 %v832_v13, %s1308_s15  ;;  %716 = vrot.lane.b32.xlu1 %v707_v7, %s1309_s16 }
 0x126   : > { %837 = vrot.lane.b32.xlu0 %v832_v13, %s1307_s14 }
 0x128   : > { %v754_v12 = vpop.permute.xlu1 %753 }
 0x129   : > { %v766_v52 = vpop.permute.xlu0 %765  ;;  %v759_v3 = vsel %vm695_vm1, %v754_v12, %v757_v58 }
 0x12a   : > { %v760_v20 = vadd.f32 %v759_v3, %v751_v2  ;;  %v768_v11 = vsel %vm705_vm2, %v763_v6, %v766_v52 }
 0x12c   : > { %v1999_v8 = vadd.f32 %v768_v11, %v760_v20 }
 0x12d   : > { %844 = vrot.lane.b32.xlu2 %v832_v13, %s1306_s13  ;;  %841 = vrot.lane.b32.xlu1 %v832_v13, %s1309_s16 }
 0x12e   : > { %774 = vrot.lane.b32.xlu0 %v1999_v8, %s1307_s14 }
 0x130   : > { %v889_v31 = vpop.permute.xlu1 %888 }
 0x131   : > { %v883_v5 = vpop.permute.xlu0 %882  ;;  %v894_v40 = vsel %vm705_vm2, %v889_v31, %v892_v37 }
 0x132   : > { %v885_v46 = vsel %vm695_vm1, %v880_v27, %v883_v5 }
 0x133   : > { %v886_v18 = vadd.f32 %v885_v46, %v877_v4 }
 0x135   : > { %771 = vrot.lane.b32.xlu2 %v1999_v8, %s1308_s15  ;;  %781 = vrot.lane.b32.xlu1 %v1999_v8, %s1306_s13  ;;  %v2014_v47 = vadd.f32 %v894_v40, %v886_v18 }
 0x136   : > { %778 = vrot.lane.b32.xlu0 %v1999_v8, %s1309_s16 }
 0x13d   : > { %904 = vrot.lane.b32.xlu2 %v2014_v47, %s1309_s16  ;;  %900 = vrot.lane.b32.xlu1 %v2014_v47, %s1307_s14 }
 0x13e   : > { %897 = vrot.lane.b32.xlu0 %v2014_v47, %s1308_s15 }
 0x146   : > { %907 = vrot.lane.b32.xlu0 %v2014_v47, %s1306_s13 }
 0x177   : > { %v720_v30 = vpop.permute.xlu2 %719 }
 0x17f   : > { %v835_v49 = vpop.permute.xlu2 %834 }
 0x187   : > { %v845_v41 = vpop.permute.xlu2 %844 }
 0x18f   : > { %v713_v33 = vpop.permute.xlu1 %712  ;;  %v772_v48 = vpop.permute.xlu2 %771 }
 0x190   : > { %v710_v24 = vpop.permute.xlu0 %709 }
 0x191   : > { %v715_v1 = vsel %vm695_vm1, %v710_v24, %v713_v33 }
 0x192   : > { %v723_v29 = vmax.f32 %v707_v7, %v715_v1 }
 0x197   : > { %v717_v60 = vpop.permute.xlu1 %716  ;;  %v905_v24 = vpop.permute.xlu2 %904 }
 0x198   : > { %v722_v62 = vsel %vm705_vm2, %v717_v60, %v720_v30  ;;  %v838_v57 = vpop.permute.xlu0 %837 }
 0x199   : > { %v724_v16 = vmax.f32 %v723_v29, %v722_v62  ;;  %v840_v53 = vsel %vm695_vm1, %v835_v49, %v838_v57 }
 0x19a   : > { %v848_v50 = vmax.f32 %v832_v13, %v840_v53 }
 0x19b   : > { %v725_v36 = vsub.f32 %v707_v7, %v724_v16  ;;  %v728_v42 = vsub.f32 %v715_v1, %v724_v16  ;;  %v731_v34 = vsub.f32 %v722_v62, %v724_v16 }
 0x19d   : > { %v726_v26 = vmul.f32 1.442695, %v725_v36  ;;  %v729_v43 = vmul.f32 1.442695, %v728_v42  ;;  %v732_v10 = vmul.f32 1.442695, %v731_v34 }
 0x19f   : > { %v842_v44 = vpop.permute.xlu1 %841  ;;  %1247 = vpow2.f32 %v726_v26 }
 0x1a0   : > { %v847_v9 = vsel %vm705_vm2, %v842_v44, %v845_v41  ;;  %v775_v32 = vpop.permute.xlu0 %774  ;;  %1249 = vpow2.f32 %v729_v43 }
 0x1a1   : > { %v849_v25 = vmax.f32 %v848_v50, %v847_v9  ;;  %v777_v45 = vsel %vm695_vm1, %v772_v48, %v775_v32 }
 0x1a2   : > { %v785_v7 = vmax.f32 %v1999_v8, %v777_v45 }
 0x1a3   : > { %v850_v61 = vsub.f32 %v832_v13, %v849_v25  ;;  %v853_v35 = vsub.f32 %v840_v53, %v849_v25  ;;  %v856_v59 = vsub.f32 %v847_v9, %v849_v25 }
 0x1a5   : > { %v851_v56 = vmul.f32 1.442695, %v850_v61  ;;  %v854_v14 = vmul.f32 1.442695, %v853_v35  ;;  %v2031_v39 = vpop.eup %1247  ;;  %v857_v52 = vmul.f32 1.442695, %v856_v59 }
 0x1a6   : > { %v1250_v12 = vpop.eup %1249 }
 0x1a7   : > { %v782_v58 = vpop.permute.xlu1 %781  ;;  %1251 = vpow2.f32 %v851_v56  ;;  %v734_v5 = vadd.f32 %v1250_v12, %v2031_v39 }
 0x1a8   : > { %v779_v0 = vpop.permute.xlu0 %778  ;;  %1253 = vpow2.f32 %v854_v14 }
 0x1a9   : > { %v784_v38 = vsel %vm705_vm2, %v779_v0, %v782_v58  ;;  %1255 = vpow2.f32 %v732_v10 }
 0x1aa   : > { %v786_v28 = vmax.f32 %v785_v7, %v784_v38 }
 0x1ac   : > { %v787_v13 = vsub.f32 %v1999_v8, %v786_v28  ;;  %v790_v6 = vsub.f32 %v777_v45, %v786_v28  ;;  %v793_v2 = vsub.f32 %v784_v38, %v786_v28 }
 0x1ad   : > { %v2034_v27 = vpop.eup %1251 }
 0x1ae   : > { %v788_v3 = vmul.f32 1.442695, %v787_v13  ;;  %v791_v20 = vmul.f32 1.442695, %v790_v6  ;;  %v794_v46 = vmul.f32 1.442695, %v793_v2  ;;  %v1254_v4 = vpop.eup %1253 }
 0x1af   : > { %v1256_v31 = vpop.eup %1255  ;;  %v901_v18 = vpop.permute.xlu1 %900  ;;  %v859_v37 = vadd.f32 %v1254_v4, %v2034_v27 }
 0x1b0   : > { %v898_v11 = vpop.permute.xlu0 %897  ;;  %1257 = vpow2.f32 %v788_v3  ;;  %v2037_v8 = vadd.f32 %v1256_v31, %v734_v5 }
 0x1b1   : > { %1259 = vpow2.f32 %v857_v52  ;;  %v903_v40 = vsel %vm695_vm1, %v898_v11, %v901_v18 }
 0x1b2   : > { %1261 = vpow2.f32 %v791_v20  ;;  %v911_v49 = vmax.f32 %v2014_v47, %v903_v40  ;;  %v747_v12 = vand.u32 2147483648, %v2037_v8  ;;  %vm741_vm7 = vweird.f32 %v2037_v8 }
 0x1b3   : > { %1263 = vpow2.f32 %v794_v46  ;;  %v745_v52 = vand.u32 2147483647, %v2037_v8 }
 0x1b4   : > { %1265 = vrcp.f32 %v2037_v8  ;;  %v748_v4 = vor.u32 1.1754944e-38, %v747_v12  ;;  %v1286_v12 = vld [vmem:[%s2201_s1 + $0xf] ss:$0 sm:$0xff] }
 0x1b5   : > { %vm746_vm11 = vcmp.eq.f32.partialorder %v745_v52, 8.507059e+37 }
 0x1b6   : > { %v2041_v30 = vpop.eup %1257 }
 0x1b7   : > { %v1260_v33 = vpop.eup %1259 }
 0x1b8   : > { %v908_v1 = vpop.permute.xlu0 %907  ;;  %v1262_v60 = vpop.eup %1261  ;;  %v2045_v62 = vadd.f32 %v1260_v33, %v859_v37 }
 0x1b9   : > { %v910_v57 = vsel %vm705_vm2, %v905_v24, %v908_v1  ;;  %v796_v29 = vadd.f32 %v1262_v60, %v2041_v30  ;;  %v1264_v16 = vpop.eup %1263 }
 0x1ba   : > { %v912_v41 = vmax.f32 %v911_v49, %v910_v57  ;;  %1267 = vrcp.f32 %v2045_v62  ;;  %v1266_v9 = vpop.eup %1265  ;;  %v870_v31 = vand.u32 2147483647, %v2045_v62  ;;  %v872_v18 = vand.u32 2147483648, %v2045_v62 }
 0x1bb   : > { %v797_v53 = vadd.f32 %v1264_v16, %v796_v29  ;;  %v737_v26 = vmul.f32 %v1266_v9, %v2037_v8  ;;  %vm742_vm4 = vweird.f32 %v1266_v9  ;;  %vm866_vm12 = vweird.f32 %v2045_v62 }
 0x1bc   : > { %v913_v50 = vsub.f32 %v2014_v47, %v912_v41  ;;  %v916_v44 = vsub.f32 %v903_v40, %v912_v41  ;;  %v919_v36 = vsub.f32 %v910_v57, %v912_v41  ;;  %vm743_vm8 = vmor %vm741_vm7, %vm742_vm4  ;;  %vm871_vm14 = vcmp.eq.f32.partialorder %v870_v31, 8.507059e+37 }
 0x1bd   : > { %1269 = vrcp.f32 %v797_v53  ;;  %v738_v48 = vsub.f32 1.0, %v737_v26  ;;  %v809_v28 = vand.u32 2147483648, %v797_v53  ;;  %vm803_vm5 = vweird.f32 %v797_v53 }
 0x1be   : > { %v914_v42 = vmul.f32 1.442695, %v913_v50  ;;  %v917_v25 = vmul.f32 1.442695, %v916_v44  ;;  %v920_v32 = vmul.f32 1.442695, %v919_v36 }
 0x1bf   : > { %v739_v7 = vmul.f32 %v1266_v9, %v738_v48  ;;  %v807_v2 = vand.u32 2147483647, %v797_v53  ;;  %v810_v20 = vor.u32 1.1754944e-38, %v809_v28  ;;  %v873_v1 = vor.u32 1.1754944e-38, %v872_v18  ;;  %v1284_v28 = vld [vmem:[%s2201_s1 + $0x9] ss:$0 sm:$0xff] }
 0x1c0   : > { %1271 = vpow2.f32 %v914_v42  ;;  %v1268_v61 = vpop.eup %1267  ;;  %v1289_v18 = vld [vmem:[%s2201_s1 + $0x14] ss:$0 sm:$0xff] }
 0x1c1   : > { %1273 = vpow2.f32 %v917_v25  ;;  %v862_v47 = vmul.f32 %v1268_v61, %v2045_v62  ;;  %v740_v13 = vadd.f32 %v1266_v9, %v739_v7  ;;  %vm867_vm9 = vweird.f32 %v1268_v61 }
 0x1c2   : > { %1275 = vpow2.f32 %v920_v32  ;;  %vm808_vm10 = vcmp.eq.f32.partialorder %v807_v2, 8.507059e+37  ;;  %vm868_vm13 = vmor %vm866_vm12, %vm867_vm9 }
 0x1c3   : > { %v1270_v43 = vpop.eup %1269  ;;  %v863_v38 = vsub.f32 1.0, %v862_v47  ;;  %v744_v11 = vsel %vm743_vm8, %v1266_v9, %v740_v13  ;;  %v1280_v47 = vld [vmem:[%s2201_s1 + $0x13] ss:$0 sm:$0xff]  ;;  %vm1101_vm8 = vcmask 859136  }
 0x1c4   : > { %v799_v35 = vmul.f32 %v1270_v43, %v797_v53  ;;  %vm804_vm3 = vweird.f32 %v1270_v43  ;;  %v749_v33 = vsel %vm746_vm11, %v748_v4, %v744_v11 }
 0x1c5   : > { %v864_v6 = vmul.f32 %v1268_v61, %v863_v38  ;;  %vm805_vm6 = vmor %vm803_vm5, %vm804_vm3  ;;  %v750_v57 = vmul.f32 %v2031_v39, %v749_v33  ;;  %v1290_v33 = vld [vmem:[%s2201_s1 + $0xb] ss:$0 sm:$0xff] }
 0x1c6   : > { %v1272_v34 = vpop.eup %1271  ;;  %v800_v45 = vsub.f32 1.0, %v799_v35  ;;  %v2296_v35 = vld [vmem:[#allocation15_spill] sm:$0xff] }
 0x1c7   : > { %v1274_v56 = vpop.eup %1273  ;;  %v865_v5 = vadd.f32 %v1268_v61, %v864_v6  ;;  %v1285_v6 = vld [vmem:[%s2201_s1 + $0xc] ss:$0 sm:$0xff] }
 0x1c8   : > { %v801_v14 = vmul.f32 %v1270_v43, %v800_v45  ;;  %v922_v58 = vadd.f32 %v1274_v56, %v1272_v34  ;;  %v1276_v0 = vpop.eup %1275  ;;  %v1281_v45 = vld [vmem:[%s2201_s1 + $0xa] ss:$0 sm:$0xff] }
 0x1c9   : > { %v869_v8 = vsel %vm868_vm13, %v1268_v61, %v865_v5  ;;  %v1279_v61 = vld [vmem:[%s2201_s1 + $0x15] ss:$0 sm:$0xff]  ;;  %v1288_v5 = vld [vmem:[%s2201_s1 + $0xd] ss:$0 sm:$0xff] }
 0x1ca   : > { %v923_v10 = vadd.f32 %v1276_v0, %v922_v58  ;;  %v802_v59 = vadd.f32 %v1270_v43, %v801_v14  ;;  %v874_v16 = vsel %vm871_vm14, %v873_v1, %v869_v8  ;;  %v1282_v14 = vld [vmem:[%s2201_s1 + $0x12] ss:$0 sm:$0xff]  ;;  %v1283_v0 = vld [vmem:[%s2201_s1 + $0x18] ss:$0 sm:$0xff] }
 0x1cb   : > { %v875_v44 = vmul.f32 %v2034_v27, %v874_v16 }
 0x1cc   : > { %1277 = vrcp.f32 %v923_v10  ;;  %v806_v3 = vsel %vm805_vm6, %v1270_v43, %v802_v59  ;;  %v935_v60 = vand.u32 2147483648, %v923_v10  ;;  %v933_v41 = vand.u32 2147483647, %v923_v10 }
 0x1cd   : > { %v811_v37 = vsel %vm808_vm10, %v810_v20, %v806_v3  ;;  %vm929_vm3 = vweird.f32 %v923_v10  ;;  %vm954_vm6 = vcmask 842752   ;;  %v1287_v20 = vld [vmem:[%s2201_s1 + $0x16] ss:$0 sm:$0xff] }
 0x1ce   : > { %v812_v24 = vmul.f32 %v2041_v30, %v811_v37  ;;  %v936_v62 = vor.u32 1.1754944e-38, %v935_v60  ;;  %vm934_vm5 = vcmp.eq.f32.partialorder %v933_v41, 8.507059e+37  ;;  %v1291_v41 = vld [vmem:[%s2201_s1 + $0xe] ss:$0 sm:$0xff] }
 0x1d0   : > { %v813_v53 = vmax.f32 %v750_v57, %v812_v24 }
 0x1d2   : > { %v1278_v46 = vpop.eup %1277  ;;  %v876_v9 = vmax.f32 %v813_v53, %v875_v44 }
 0x1d3   : > { %v925_v40 = vmul.f32 %v1278_v46, %v923_v10  ;;  %vm930_vm15 = vweird.f32 %v1278_v46 }
 0x1d4   : > { %vm931_vm4 = vmor %vm929_vm3, %vm930_vm15 }
 0x1d5   : > { %v926_v49 = vsub.f32 1.0, %v925_v40 }
 0x1d7   : > { %v927_v29 = vmul.f32 %v1278_v46, %v926_v49 }
 0x1d9   : > { %v928_v50 = vadd.f32 %v1278_v46, %v927_v29 }
 0x1db   : > { %v932_v36 = vsel %vm931_vm4, %v1278_v46, %v928_v50 }
 0x1dc   : > { %v937_v30 = vsel %vm934_vm5, %v936_v62, %v932_v36 }
 0x1dd   : > { %v938_v42 = vmul.f32 %v1272_v34, %v937_v30 }
 0x1df   : > { %v939_v25 = vmax.f32 %v876_v9, %v938_v42 }
 0x1e1   : > { %948 = vrot.lane.b32.xlu0 %v939_v25, %s1310_s21  ;;  %944 = vrot.lane.b32.xlu2 %v939_v25, %s1305_s25  ;;  %v1031_v43 = vmul.f32 %v1279_v61, %v939_v25  ;;  %v956_v48 = vmul.f32 %v2296_v35, %v939_v25  ;;  %v1026_v58 = vmul.f32 %v1282_v14, %v939_v25  ;;  %s222_s25 = scalar_lea.vmem %s2205_s5, %s1193_s26 }
 0x1e2   : > { %941 = vrot.lane.b32.xlu1 %v939_v25, %s1304_s24  ;;  %v2087_v7 = vmul.f32 %v1283_v0, %v939_v25  ;;  %v991_v13 = vmul.f32 %v1284_v28, %v939_v25  ;;  %v996_v2 = vmul.f32 %v1285_v6, %v939_v25  ;;  %v1011_v52 = vmul.f32 %v1286_v12, %v939_v25 }
 0x1e3   : > { %v1033_v59 = vrot.slane %v1031_v43, 1  ;;  %v961_v4 = vmul.f32 %v1638_v51, %v939_v25 }
 0x1e4   : > { %v1048_v49 = vrot.slane %v2087_v7, 2  ;;  %v998_v29 = vrot.slane %v996_v2, 1 }
 0x1e5   : > { %v963_v62 = vrot.slane %v961_v4, 1 }
 0x1ea   : > { %951 = vrot.lane.b32.xlu1 %v939_v25, %s1311_s22 }
 0x23b   : > { %v945_v39 = vpop.permute.xlu2 %944 }
 0x253   : > { %v949_v38 = vpop.permute.xlu0 %948 }
 0x254   : > { %v942_v32 = vpop.permute.xlu1 %941 }
 0x255   : > { %v2065_v26 = vsel %vm231_vm0, %v942_v32, %v945_v39  ;;  %v1293_v39 = vld [vmem:[%s2201_s1 + $0x10] ss:$0 sm:$0xff]  ;;  %vm1105_vm0 = vcmask 1040384  }
 0x256   : > { %v957_v27 = vmul.f32 %v1596_v17, %v2065_v26  ;;  %v1027_v34 = vmul.f32 %v1280_v47, %v2065_v26  ;;  %v992_v17 = vmul.f32 %v1281_v45, %v2065_v26  ;;  %v1036_v11 = vmul.f32 %v1287_v20, %v2065_v26  ;;  %v1295_v47 = vld [vmem:[%s2201_s1 + $0x11] ss:$0 sm:$0xff] }
 0x257   : > { %v1001_v46 = vmul.f32 %v1288_v5, %v2065_v26  ;;  %v966_v51 = vmul.f32 %v1624_v23, %v2065_v26  ;;  %v1292_v23 = vld [vmem:[%s2201_s1 + $0x19] ss:$0 sm:$0xff]  ;;  %v1016_v32 = vmul.f32 %v1293_v39, %v2065_v26  ;;  %v981_v45 = vmul.f32 %v1760_v63, %v2065_v26 }
 0x258   : > { %v958_v56 = vadd.f32 %v957_v27, %v956_v48  ;;  %v1028_v31 = vadd.f32 %v1027_v34, %v1026_v58  ;;  %v993_v40 = vadd.f32 %v992_v17, %v991_v13  ;;  %v1038_v53 = vrot.slane %v1036_v11, 1 }
 0x259   : > { %v1003_v50 = vrot.slane %v1001_v46, 1  ;;  %v1051_v42 = vmul.f32 %v1292_v23, %v2065_v26  ;;  %v968_v27 = vrot.slane %v966_v51, 1  ;;  %v1013_v48 = vrot.slane %v1011_v52, 2  ;;  %v1085_v51 = vld [vmem:[%s2203_s3 + $0x10] sm:$0xff] }
 0x25a   : > { %v1018_v7 = vrot.slane %v1016_v32, 2  ;;  %v983_v2 = vrot.slane %v981_v45, 2 }
 0x25b   : > { %v1053_v0 = vrot.slane %v1051_v42, 2 }
 0x25c   : > { %v952_v10 = vpop.permute.xlu1 %951 }
 0x25d   : > { %v955_v3 = vsel %vm954_vm6, %v949_v38, %v952_v10 }
 0x25e   : > { %v1029_v37 = vmul.f32 %v1289_v18, %v955_v3  ;;  %v994_v8 = vmul.f32 %v1290_v33, %v955_v3  ;;  %v1041_v24 = vmul.f32 %v1550_v55, %v955_v3  ;;  %v959_v1 = vmul.f32 %v2281_v54, %v955_v3  ;;  %v1093_v18 = vld [vmem:[%s2203_s3 + $0x50] sm:$0xff]  ;;  %v1090_v33 = vld [vmem:[%s2203_s3 + $0x38] sm:$0xff] }
 0x25f   : > { %v1006_v16 = vmul.f32 %v1291_v41, %v955_v3  ;;  %v976_v55 = vmul.f32 %v1686_v21, %v939_v25  ;;  %v971_v54 = vmul.f32 %v1669_v19, %v955_v3  ;;  %v1294_v19 = vld [vmem:[%s2201_s1 + $0x1a] ss:$0 sm:$0xff]  ;;  %v1021_v34 = vmul.f32 %v1295_v47, %v955_v3 }
 0x260   : > { %v1030_v60 = vadd.f32 %v1029_v37, %v1028_v31  ;;  %v995_v57 = vadd.f32 %v994_v8, %v993_v40  ;;  %v960_v30 = vadd.f32 %v959_v1, %v958_v56  ;;  %v1043_v9 = vrot.slane %v1041_v24, 1  ;;  %v1094_v31 = vld [vmem:[%s2203_s3 + $0x58] sm:$0xff]  ;;  %v1092_v37 = vld [vmem:[%s2203_s3 + $0x48] sm:$0xff]  ;;  %v1091_v40 = vld [vmem:[%s2203_s3 + $0x40] sm:$0xff] }
 0x261   : > { %v1008_v61 = vrot.slane %v1006_v16, 1  ;;  %v1056_v35 = vmul.f32 %v1294_v19, %v955_v3  ;;  %v973_v14 = vrot.slane %v971_v54, 1  ;;  %v978_v38 = vrot.slane %v976_v55, 2  ;;  %v1089_v8 = vld [vmem:[%s2203_s3 + $0x30] sm:$0xff]  ;;  %v1088_v24 = vld [vmem:[%s2203_s3 + $0x28] sm:$0xff]  ;;  %v1086_v1 = vld [vmem:[%s2203_s3 + $0x18] sm:$0xff] }
 0x262   : > { %v1035_v44 = vadd.f32 %v1033_v59, %v1030_v60  ;;  %v1000_v36 = vadd.f32 %v998_v29, %v995_v57  ;;  %v965_v43 = vadd.f32 %v963_v62, %v960_v30  ;;  %v986_v28 = vmul.f32 %v2287_v22, %v955_v3  ;;  %v1096_v22 = vld [vmem:[%s2203_s3 + $0x68] sm:$0x1]  ;;  %v1095_v3 = vld [vmem:[%s2203_s3 + $0x60] sm:$0xff] }
 0x263   : > { %v1058_v6 = vrot.slane %v1056_v35, 2  ;;  %v1023_v20 = vrot.slane %v1021_v34, 2  ;;  %1197 = vmatpush.msk.msra.mxu0 %vm1105_vm0, %v1096_v22  ;;  %v1084_v60 = vld [vmem:[%s2203_s3 + $0x8] sm:$0xff]  ;;  %v1083_v57 = vld [vmem:[%s2203_s3] sm:$0xff] }
 0x264   : > { %v1040_v21 = vadd.f32 %v1038_v53, %v1035_v44  ;;  %v1005_v25 = vadd.f32 %v1003_v50, %v1000_v36  ;;  %v970_v58 = vadd.f32 %v968_v27, %v965_v43  ;;  %v988_v26 = vrot.slane %v986_v28, 2 }
 0x265   : > { %1112 = vmatpush.msra.mxu0 %v1095_v3 }
 0x266   : > { %v1045_v17 = vadd.f32 %v1043_v9, %v1040_v21  ;;  %v1010_v56 = vadd.f32 %v1008_v61, %v1005_v25  ;;  %v975_v13 = vadd.f32 %v973_v14, %v970_v58  ;;  %v1246_v9 = vld [vmem:[%s2204_s4] ss:$0 sm:$0xff] }
 0x267   : > { %1113 = vmatpush.msra.mxu0 %v1094_v31 }
 0x268   : > { %v1050_v10 = vadd.f32 %v1048_v49, %v1045_v17  ;;  %v1015_v59 = vadd.f32 %v1013_v48, %v1010_v56  ;;  %v980_v11 = vadd.f32 %v978_v38, %v975_v13  ;;  %v1087_v49 = vld [vmem:[%s2203_s3 + $0x20] sm:$0xff] }
 0x269   : > { %1114 = vmatpush.msra.mxu0 %v1093_v18 }
 0x26a   : > { %v1055_v12 = vadd.f32 %v1053_v0, %v1050_v10  ;;  %v1020_v52 = vadd.f32 %v1018_v7, %v1015_v59  ;;  %v985_v46 = vadd.f32 %v983_v2, %v980_v11 }
 0x26b   : > { %1115 = vmatpush.msra.mxu0 %v1092_v37 }
 0x26c   : > { %v1060_v5 = vadd.f32 %v1058_v6, %v1055_v12  ;;  %v1025_v63 = vadd.f32 %v1023_v20, %v1020_v52  ;;  %v990_v4 = vadd.f32 %v988_v26, %v985_v46 }
 0x26d   : > { %1116 = vmatpush.msra.mxu0 %v1091_v40 }
 0x26e   : > { %1072 = vrot.lane.b32.xlu1 %v1060_v5, %s1309_s16  ;;  %1066 = vrot.lane.b32.xlu0 %v1025_v63, %s1307_s14  ;;  %v1061_v53 = vadd.f32 %v1981_v15, %v990_v4 }
 0x26f   : > { %1063 = vrot.lane.b32.xlu2 %v1025_v63, %s1308_s15  ;;  %1117 = vmatpush.msra.mxu0 %v1090_v33 }
 0x271   : > { %1118 = vmatpush.msra.mxu0 %v1089_v8 }
 0x273   : > { %1119 = vmatpush.msra.mxu0 %v1088_v24 }
 0x275   : > { %1120 = vmatpush.msra.mxu0 %v1087_v49 }
 0x277   : > { %1075 = vrot.lane.b32.xlu2 %v1060_v5, %s1306_s13  ;;  %1121 = vmatpush.msra.mxu0 %v1086_v1 }
 0x279   : > { %1122 = vmatpush.msra.mxu0 %v1085_v51 }
 0x27b   : > { %1123 = vmatpush.msra.mxu0 %v1084_v60 }
 0x27d   : > { %1124 = vmatpush.msra.mxu0 %v1083_v57 }
 0x2c9   : > { %v1064_v29 = vpop.permute.xlu2 %1063 }
 0x2d1   : > { %v1076_v62 = vpop.permute.xlu2 %1075 }
 0x2e0   : > { %v1073_v41 = vpop.permute.xlu1 %1072  ;;  %v1067_v16 = vpop.permute.xlu0 %1066 }
 0x2e1   : > { %v1069_v50 = vsel %vm695_vm1, %v1064_v29, %v1067_v16  ;;  %v1078_v44 = vsel %vm705_vm2, %v1073_v41, %v1076_v62 }
 0x2e2   : > { %v1070_v55 = vadd.f32 %v1069_v50, %v1061_v53 }
 0x2e4   : > { %v1079_v36 = vadd.f32 %v1078_v44, %v1070_v55 }
 0x2e6   : > { %vm1080_vm7 = vcmp.ge.f32.partialorder %v1079_v36, 0.0  ;;  %v1081_v54 = vmul.f32 0.01, %v1079_v36 }
 0x2e8   : > { %v1082_v30 = vsel %vm1080_vm7, %v1079_v36, %v1081_v54 }
 0x2e9   : > { %1198 = vmatmul.msk.f32.vlgmr.msra.gmra.mxu0 %vm1101_vm8, %v1082_v30 }
 0x366   : > { %v1126_v23 = vpop.f32.mrf.mxu0 }
 0x367   : > { %v1127_v42 = vadd.f32 %v1246_v9, %v1126_v23 }
 0x369   : > { %vm1129_vm1 = vcmp.ge.f32.partialorder %v1127_v42, 0.0  ;;  %v1130_v15 = vmul.f32 0.01, %v1127_v42 }
 0x36b   : > { %v1131_v39 = vsel %vm1129_vm1, %v1127_v42, %v1130_v15 }
 0x36c   : > { %1132 = vst [vmem:[%s222_s25] sm:$0xf] %v1131_v39 }
 0x36d PF: > { %s15_s18 = sadd.s32 1, %s1302_s18  }
 0x36e   : > { %p12_p4 = scmp.ge.s32.totalorder %s15_s18, 4  }
 0x370   :  { %14 = sbr.rel (!%p12_p4) target bundleno = 1 (0x1), region = 73 }

</bundles_post_ra>
